<compile_context>
chip_gen: v7x
topology: tpu7x:2x2x1
jax: 0.10.0
libtpu: 0.0.40
codegen_flags: <defaults>
</compile_context>

<pallas_src>
import functools

import jax
import jax.numpy as jnp
from jax.experimental import pallas as pl

# ---- small, deterministic model configuration (scaled-down ModelArgs) ----
D_MODEL = 32
N_HEADS = 4
D_HEAD_V = 16
D_LATENT_KV = 32
D_LATENT_Q = 32
D_NOPE = 8
D_ROPE = 8
D_HEAD_QK = D_NOPE + D_ROPE          # 16
SCALE = D_HEAD_QK ** (-0.5)
NORM_EPS = 1e-6                      # RMSNorm default eps in the reference module

LANES = 128
D_A = D_LATENT_Q + D_LATENT_KV + D_ROPE   # 72: fused (wq_a | wkv_a) output width
A_PAD = 80                                # padded to a 16-row multiple (bf16 tiling)
D_QB = N_HEADS * D_HEAD_QK                # 64
D_HC = N_HEADS * D_LATENT_KV              # 128
D_HV = N_HEADS * D_HEAD_V                 # 64

# matrix-slab (bf16, width 128) row offsets -- all multiples of 16
OFF_A = 0                       # (A_PAD, D_MODEL)  fused wq_a|wkv_a (rows 72:80 zero)
OFF_QB = OFF_A + A_PAD          # (D_QB, D_LATENT_Q)  wq_b
OFF_NOPE = OFF_QB + D_QB        # (D_QB, D_HC)        block-diag wkv_b[:, :d_nope]
OFF_V = OFF_NOPE + D_QB         # (D_HC, D_HV)        block-diag wkv_b[:, -d_head_v:]
OFF_O = OFF_V + D_HC            # (D_MODEL, D_HV)     wo
MAT_ROWS = OFF_O + D_MODEL      # 368
VEC_ROWS = 8                    # f32 vector slab: norms + biases, one (8,128) tile


def _mm_t(a, w):
    # (m, k) @ (n, k)^T -> (m, n): nn.Linear weight convention, f32 accumulation.
    return jax.lax.dot_general(a, w, (((1,), (1,)), ((), ())),
                               preferred_element_type=jnp.float32)


def _mm(a, w):
    # (m, k) @ (k, n) -> (m, n), f32 accumulation.
    return jax.lax.dot_general(a, w, (((1,), (0,)), ((), ())),
                               preferred_element_type=jnp.float32)


def _rms(x, w):
    var = jnp.mean(x * x, axis=-1, keepdims=True)
    return x * jax.lax.rsqrt(var + NORM_EPS) * w


def _mla(x, vec_ref, mat_ref, batch, seq):
    """RMSNorm + MultiheadLatentAttn on a (B*S, D) f32 slab."""
    bf16 = jnp.bfloat16

    # --- parameter views (static slices of the two packed slabs) ---
    norm_w = vec_ref[0:1, 0:D_MODEL]
    q_norm_w = vec_ref[1:2, 0:D_LATENT_Q]
    kv_norm_w = vec_ref[2:3, 0:D_LATENT_KV]
    b_a = vec_ref[3:4, 0:A_PAD]                 # fused bias (cols 72:80 are zero)
    b_qb = vec_ref[4:5, 0:D_QB]
    b_o = vec_ref[5:6, 0:D_MODEL]

    w_a = mat_ref[OFF_A:OFF_A + A_PAD, 0:D_MODEL]            # (80, 32)  bf16
    w_qb = mat_ref[OFF_QB:OFF_QB + D_QB, 0:D_LATENT_Q]       # (64, 32)
    w_nope = mat_ref[OFF_NOPE:OFF_NOPE + D_QB, :]            # (64, 128) block-diag
    w_v = mat_ref[OFF_V:OFF_V + D_HC, 0:D_HV]                # (128, 64) block-diag
    w_o = mat_ref[OFF_O:OFF_O + D_MODEL, 0:D_HV]             # (32, 64)

    # --- pre-norm + fused {wq_a | wkv_a_kv | wkv_a_rope} projection ---
    hn = _rms(x, norm_w).astype(bf16)
    proj = _mm_t(hn, w_a) + b_a                               # (BS, 80) f32
    q_lat = _rms(proj[:, 0:D_LATENT_Q], q_norm_w)             # (BS, 32)
    kv_n = _rms(proj[:, D_LATENT_Q:D_LATENT_Q + D_LATENT_KV], kv_norm_w)  # (BS, 32)
    k_rope = proj[:, D_LATENT_Q + D_LATENT_KV:D_A]            # (BS, 8) rope==identity

    # --- query path: one 2D matmul for wq_b (heads on lanes), then the
    # per-head wkv_b_nope absorption as one block-diagonal 2D matmul ---
    q_flat = _mm_t(q_lat.astype(bf16), w_qb) + b_qb           # (BS, H*16) f32
    qn_kv = _mm(q_flat.astype(bf16), w_nope)                  # (BS, H*C=128) f32

    # --- relayout heads from lanes onto rows: (B, H*S, .) for attention ---
    qn = jnp.concatenate(
        [qn_kv[:, h * D_LATENT_KV:(h + 1) * D_LATENT_KV].reshape(batch, seq, D_LATENT_KV)
         for h in range(N_HEADS)], axis=1)                    # (B, H*S, C)
    qr = jnp.concatenate(
        [q_flat[:, h * D_HEAD_QK + D_NOPE:(h + 1) * D_HEAD_QK].reshape(batch, seq, D_ROPE)
         for h in range(N_HEADS)], axis=1)                    # (B, H*S, R)
    kv3 = kv_n.reshape(batch, seq, D_LATENT_KV).astype(bf16)  # (B, T, C)
    kr3 = k_rope.reshape(batch, seq, D_ROPE).astype(bf16)     # (B, T, R)

    # --- attention: one batched contraction over all (b, h); shared K/V is
    # contracted directly (never replicated per head) ---
    scores = (jnp.einsum('bmc,btc->bmt', qn.astype(bf16), kv3,
                         preferred_element_type=jnp.float32)
              + jnp.einsum('bmr,btr->bmt', qr.astype(bf16), kr3,
                           preferred_element_type=jnp.float32)) * SCALE
    mx = jnp.max(scores, axis=-1, keepdims=True)
    p = jnp.exp(scores - mx)
    attn = p * pl.reciprocal(jnp.sum(p, axis=-1, keepdims=True), approx=True)
    v_lat = jnp.einsum('bmt,btc->bmc', attn.astype(bf16), kv3,
                       preferred_element_type=jnp.float32)    # (B, H*S, C)

    # --- heads back onto lanes; per-head value projection via block-diagonal
    # weight and output projection with the head-sum folded into one K=H*Dv
    # contraction ---
    v_cat = jnp.concatenate(
        [v_lat[:, h * seq:(h + 1) * seq, :] for h in range(N_HEADS)],
        axis=-1).reshape(batch * seq, D_HC)                   # (BS, 128)
    v_heads = _mm(v_cat.astype(bf16), w_v)                    # (BS, H*Dv) f32
    return _mm_t(v_heads.astype(bf16), w_o) + b_o             # (BS, D) f32


def block_kernel(x_ref, attn_vec, attn_mat, mlp_vec, mlp_mat, o_ref, *, batch, seq):
    x = x_ref[...]                                   # (B*S, D) f32
    x = x + _mla(x, attn_vec, attn_mat, batch, seq)  # h = h + attn(attn_norm(h))
    x = x + _mla(x, mlp_vec, mlp_mat, batch, seq)    # h = h + mlp(mlp_norm(h))
    o_ref[...] = x


def _pack_mla_params(p):
    """Pack one MLA sublayer into a (8,128) f32 vector slab and a (368,128)
    bf16 matrix slab.  Pure layout plumbing (zero padding / block-diagonal
    placement); the kernel math matches the reference op-for-op."""
    vec = jnp.zeros((VEC_ROWS, LANES), jnp.float32)
    vec = vec.at[0, 0:D_MODEL].set(p['norm_w'])
    vec = vec.at[1, 0:D_LATENT_Q].set(p['q_norm_w'])
    vec = vec.at[2, 0:D_LATENT_KV].set(p['kv_norm_w'])
    vec = vec.at[3, 0:D_A].set(jnp.concatenate([p['wq_a_b'], p['wkv_a_b']]))
    vec = vec.at[4, 0:D_QB].set(p['wq_b_b'])
    vec = vec.at[5, 0:D_MODEL].set(p['wo_b'])

    # block-diagonal views of wkv_b (reference: wkv_b.view(H, -1, C))
    wkv_b_h = p['wkv_b_w'].reshape(N_HEADS, D_NOPE + D_HEAD_V, D_LATENT_KV)
    w_nope = jnp.zeros((D_QB, D_HC), jnp.float32)     # rope rows stay zero
    w_v = jnp.zeros((D_HC, D_HV), jnp.float32)
    for h in range(N_HEADS):
        w_nope = w_nope.at[h * D_HEAD_QK:h * D_HEAD_QK + D_NOPE,
                           h * D_LATENT_KV:(h + 1) * D_LATENT_KV].set(
                               wkv_b_h[h, :D_NOPE])
        w_v = w_v.at[h * D_LATENT_KV:(h + 1) * D_LATENT_KV,
                     h * D_HEAD_V:(h + 1) * D_HEAD_V].set(wkv_b_h[h, D_NOPE:].T)

    mat = jnp.zeros((MAT_ROWS, LANES), jnp.float32)
    mat = mat.at[OFF_A:OFF_A + D_LATENT_Q, 0:D_MODEL].set(p['wq_a_w'])
    mat = mat.at[OFF_A + D_LATENT_Q:OFF_A + D_A, 0:D_MODEL].set(p['wkv_a_w'])
    mat = mat.at[OFF_QB:OFF_QB + D_QB, 0:D_LATENT_Q].set(p['wq_b_w'])
    mat = mat.at[OFF_NOPE:OFF_NOPE + D_QB, 0:D_HC].set(w_nope)
    mat = mat.at[OFF_V:OFF_V + D_HC, 0:D_HV].set(w_v)
    mat = mat.at[OFF_O:OFF_O + D_MODEL, 0:D_HV].set(p['wo_w'])
    return vec, mat.astype(jnp.bfloat16)              # bf16 MXU operands


def transformer_block(h, attn_params, mlp_params):
    B, S, D = h.shape
    x = h.reshape(B * S, D)        # fold batch into the sublane axis (layout only)
    a_vec, a_mat = _pack_mla_params(attn_params)
    m_vec, m_mat = _pack_mla_params(mlp_params)
    # Single invocation (no grid): every operand is a full-array VMEM block and
    # the input HBM buffer is reused for the output.
    out = pl.pallas_call(
        functools.partial(block_kernel, batch=B, seq=S),
        out_shape=jax.ShapeDtypeStruct((B * S, D), jnp.float32),
        input_output_aliases={0: 0},
    )(x, a_vec, a_mat, m_vec, m_mat)
    return out.reshape(B, S, D)


def init_mla_params(key):
    """Raw nn.Linear-style parameters for one MLA sublayer."""
    ks = jax.random.split(key, 5)

    def lin(k, out_dim, in_dim):
        k1, k2 = jax.random.split(k)
        w = jax.random.normal(k1, (out_dim, in_dim), jnp.float32) * 0.05
        b = jax.random.normal(k2, (out_dim,), jnp.float32) * 0.02
        return w, b

    wq_a_w, wq_a_b = lin(ks[0], D_LATENT_Q, D_MODEL)
    wq_b_w, wq_b_b = lin(ks[1], N_HEADS * D_HEAD_QK, D_LATENT_Q)
    wkv_a_w, wkv_a_b = lin(ks[2], D_LATENT_KV + D_ROPE, D_MODEL)
    wkv_b_w = jax.random.normal(                       # reference uses only .weight
        ks[3], (N_HEADS * (D_NOPE + D_HEAD_V), D_LATENT_KV), jnp.float32) * 0.05
    wo_w, wo_b = lin(ks[4], D_MODEL, N_HEADS * D_HEAD_V)

    return dict(
        norm_w=jnp.ones((D_MODEL,), jnp.float32),
        q_norm_w=jnp.ones((D_LATENT_Q,), jnp.float32),
        kv_norm_w=jnp.ones((D_LATENT_KV,), jnp.float32),
        wq_a_w=wq_a_w, wq_a_b=wq_a_b,
        wq_b_w=wq_b_w, wq_b_b=wq_b_b,
        wkv_a_w=wkv_a_w, wkv_a_b=wkv_a_b,
        wkv_b_w=wkv_b_w,
        wo_w=wo_w, wo_b=wo_b,
    )


if __name__ == "__main__":
    key = jax.random.PRNGKey(0)
    k_h, k_attn, k_mlp = jax.random.split(key, 3)

    B, S = 2, 8
    h = jax.random.normal(k_h, (B, S, D_MODEL), jnp.float32)

    attn_params = init_mla_params(k_attn)
    mlp_params = init_mla_params(k_mlp)

    out = jax.jit(transformer_block)(h, attn_params, mlp_params)
    jax.block_until_ready(out)
    assert out.shape == (B, S, D_MODEL) and out.dtype == jnp.float32
    print("KERNEL_OK")
</pallas_src>

<mosaic_0001>
module attributes {stable_mosaic.version = 11 : i64} {
  func.func @block_kernel(%arg0: memref<16x32xf32, #tpu.memory_space<vmem>>, %arg1: memref<8x128xf32, #tpu.memory_space<vmem>>, %arg2: memref<368x128xbf16, #tpu.memory_space<vmem>>, %arg3: memref<8x128xf32, #tpu.memory_space<vmem>>, %arg4: memref<368x128xbf16, #tpu.memory_space<vmem>>, %arg5: memref<16x32xf32, #tpu.memory_space<vmem>>) attributes {dimension_semantics = [], scalar_prefetch = 0 : i64, scratch_operands = 0 : i64, tpu.core_type = #tpu.core_type<tc>} {
    %c0 = arith.constant 0 : index
    %c0_0 = arith.constant 0 : index
    %0 = vector.load %arg0[%c0, %c0_0] : memref<16x32xf32, #tpu.memory_space<vmem>>, vector<16x32xf32>
    %c0_1 = arith.constant 0 : index
    %c0_2 = arith.constant 0 : index
    %1 = vector.load %arg1[%c0_1, %c0_2] : memref<8x128xf32, #tpu.memory_space<vmem>>, vector<1x32xf32>
    %c1 = arith.constant 1 : index
    %c0_3 = arith.constant 0 : index
    %2 = vector.load %arg1[%c1, %c0_3] : memref<8x128xf32, #tpu.memory_space<vmem>>, vector<1x32xf32>
    %c2 = arith.constant 2 : index
    %c0_4 = arith.constant 0 : index
    %3 = vector.load %arg1[%c2, %c0_4] : memref<8x128xf32, #tpu.memory_space<vmem>>, vector<1x32xf32>
    %c3 = arith.constant 3 : index
    %c0_5 = arith.constant 0 : index
    %4 = vector.load %arg1[%c3, %c0_5] : memref<8x128xf32, #tpu.memory_space<vmem>>, vector<1x80xf32>
    %c4 = arith.constant 4 : index
    %c0_6 = arith.constant 0 : index
    %5 = vector.load %arg1[%c4, %c0_6] : memref<8x128xf32, #tpu.memory_space<vmem>>, vector<1x64xf32>
    %c5 = arith.constant 5 : index
    %c0_7 = arith.constant 0 : index
    %6 = vector.load %arg1[%c5, %c0_7] : memref<8x128xf32, #tpu.memory_space<vmem>>, vector<1x32xf32>
    %c0_8 = arith.constant 0 : index
    %c0_9 = arith.constant 0 : index
    %7 = vector.load %arg2[%c0_8, %c0_9] : memref<368x128xbf16, #tpu.memory_space<vmem>>, vector<80x32xbf16>
    %c80 = arith.constant 80 : index
    %c0_10 = arith.constant 0 : index
    %8 = vector.load %arg2[%c80, %c0_10] : memref<368x128xbf16, #tpu.memory_space<vmem>>, vector<64x32xbf16>
    %c144 = arith.constant 144 : index
    %c0_11 = arith.constant 0 : index
    %9 = vector.load %arg2[%c144, %c0_11] : memref<368x128xbf16, #tpu.memory_space<vmem>>, vector<64x128xbf16>
    %c208 = arith.constant 208 : index
    %c0_12 = arith.constant 0 : index
    %10 = vector.load %arg2[%c208, %c0_12] : memref<368x128xbf16, #tpu.memory_space<vmem>>, vector<128x64xbf16>
    %c336 = arith.constant 336 : index
    %c0_13 = arith.constant 0 : index
    %11 = vector.load %arg2[%c336, %c0_13] : memref<368x128xbf16, #tpu.memory_space<vmem>>, vector<32x64xbf16>
    %12 = arith.mulf %0, %0 : vector<16x32xf32>
    %cst = arith.constant dense<0.000000e+00> : vector<16xf32>
    %13 = vector.multi_reduction <add>, %12, %cst [1] : vector<16x32xf32> to vector<16xf32>
    %14 = vector.shape_cast %13 : vector<16xf32> to vector<16x1xf32>
    %cst_14 = arith.constant 3.200000e+01 : f32
    %15 = vector.broadcast %cst_14 : f32 to vector<16x1xf32>
    %16 = arith.divf %14, %15 : vector<16x1xf32>
    %cst_15 = arith.constant 9.99999997E-7 : f32
    %17 = vector.broadcast %cst_15 : f32 to vector<16x1xf32>
    %18 = arith.addf %16, %17 : vector<16x1xf32>
    %19 = math.rsqrt %18 : vector<16x1xf32>
    %20 = vector.broadcast %19 : vector<16x1xf32> to vector<16x32xf32>
    %21 = arith.mulf %0, %20 : vector<16x32xf32>
    %22 = vector.broadcast %1 : vector<1x32xf32> to vector<16x32xf32>
    %23 = arith.mulf %21, %22 : vector<16x32xf32>
    %24 = arith.truncf %23 : vector<16x32xf32> to vector<16x32xbf16>
    %cst_16 = arith.constant dense<0.000000e+00> : vector<16x80xf32>
    %25 = tpu.matmul %24, %7, %cst_16 {dimension_numbers = #tpu.dot_dimension_numbers<[1], [1], [0], [0], [0, 0, 1, 0], [], []>} : vector<16x32xbf16>, vector<80x32xbf16>, vector<16x80xf32> -> vector<16x80xf32>
    %26 = vector.broadcast %4 : vector<1x80xf32> to vector<16x80xf32>
    %27 = arith.addf %25, %26 : vector<16x80xf32>
    %28 = vector.extract_strided_slice %27 {offsets = [0, 0], sizes = [16, 32], strides = [1, 1]} : vector<16x80xf32> to vector<16x32xf32>
    %29 = arith.mulf %28, %28 : vector<16x32xf32>
    %cst_17 = arith.constant dense<0.000000e+00> : vector<16xf32>
    %30 = vector.multi_reduction <add>, %29, %cst_17 [1] : vector<16x32xf32> to vector<16xf32>
    %31 = vector.shape_cast %30 : vector<16xf32> to vector<16x1xf32>
    %cst_18 = arith.constant 3.200000e+01 : f32
    %32 = vector.broadcast %cst_18 : f32 to vector<16x1xf32>
    %33 = arith.divf %31, %32 : vector<16x1xf32>
    %cst_19 = arith.constant 9.99999997E-7 : f32
    %34 = vector.broadcast %cst_19 : f32 to vector<16x1xf32>
    %35 = arith.addf %33, %34 : vector<16x1xf32>
    %36 = math.rsqrt %35 : vector<16x1xf32>
    %37 = vector.broadcast %36 : vector<16x1xf32> to vector<16x32xf32>
    %38 = arith.mulf %28, %37 : vector<16x32xf32>
    %39 = vector.broadcast %2 : vector<1x32xf32> to vector<16x32xf32>
    %40 = arith.mulf %38, %39 : vector<16x32xf32>
    %41 = vector.extract_strided_slice %27 {offsets = [0, 32], sizes = [16, 32], strides = [1, 1]} : vector<16x80xf32> to vector<16x32xf32>
    %42 = arith.mulf %41, %41 : vector<16x32xf32>
    %cst_20 = arith.constant dense<0.000000e+00> : vector<16xf32>
    %43 = vector.multi_reduction <add>, %42, %cst_20 [1] : vector<16x32xf32> to vector<16xf32>
    %44 = vector.shape_cast %43 : vector<16xf32> to vector<16x1xf32>
    %cst_21 = arith.constant 3.200000e+01 : f32
    %45 = vector.broadcast %cst_21 : f32 to vector<16x1xf32>
    %46 = arith.divf %44, %45 : vector<16x1xf32>
    %cst_22 = arith.constant 9.99999997E-7 : f32
    %47 = vector.broadcast %cst_22 : f32 to vector<16x1xf32>
    %48 = arith.addf %46, %47 : vector<16x1xf32>
    %49 = math.rsqrt %48 : vector<16x1xf32>
    %50 = vector.broadcast %49 : vector<16x1xf32> to vector<16x32xf32>
    %51 = arith.mulf %41, %50 : vector<16x32xf32>
    %52 = vector.broadcast %3 : vector<1x32xf32> to vector<16x32xf32>
    %53 = arith.mulf %51, %52 : vector<16x32xf32>
    %54 = vector.extract_strided_slice %27 {offsets = [0, 64], sizes = [16, 8], strides = [1, 1]} : vector<16x80xf32> to vector<16x8xf32>
    %55 = arith.truncf %40 : vector<16x32xf32> to vector<16x32xbf16>
    %cst_23 = arith.constant dense<0.000000e+00> : vector<16x64xf32>
    %56 = tpu.matmul %55, %8, %cst_23 {dimension_numbers = #tpu.dot_dimension_numbers<[1], [1], [0], [0], [0, 0, 1, 0], [], []>} : vector<16x32xbf16>, vector<64x32xbf16>, vector<16x64xf32> -> vector<16x64xf32>
    %57 = vector.broadcast %5 : vector<1x64xf32> to vector<16x64xf32>
    %58 = arith.addf %56, %57 : vector<16x64xf32>
    %59 = arith.truncf %58 : vector<16x64xf32> to vector<16x64xbf16>
    %cst_24 = arith.constant dense<0.000000e+00> : vector<16x128xf32>
    %60 = tpu.matmul %59, %9, %cst_24 {dimension_numbers = #tpu.dot_dimension_numbers<[1], [0], [0], [1], [0, 0, 1, 1], [], []>} : vector<16x64xbf16>, vector<64x128xbf16>, vector<16x128xf32> -> vector<16x128xf32>
    %61 = vector.extract_strided_slice %60 {offsets = [0, 0], sizes = [16, 32], strides = [1, 1]} : vector<16x128xf32> to vector<16x32xf32>
    %62 = vector.shape_cast %61 : vector<16x32xf32> to vector<2x8x32xf32>
    %63 = vector.extract_strided_slice %60 {offsets = [0, 32], sizes = [16, 32], strides = [1, 1]} : vector<16x128xf32> to vector<16x32xf32>
    %64 = vector.shape_cast %63 : vector<16x32xf32> to vector<2x8x32xf32>
    %65 = vector.extract_strided_slice %60 {offsets = [0, 64], sizes = [16, 32], strides = [1, 1]} : vector<16x128xf32> to vector<16x32xf32>
    %66 = vector.shape_cast %65 : vector<16x32xf32> to vector<2x8x32xf32>
    %67 = vector.extract_strided_slice %60 {offsets = [0, 96], sizes = [16, 32], strides = [1, 1]} : vector<16x128xf32> to vector<16x32xf32>
    %68 = vector.shape_cast %67 : vector<16x32xf32> to vector<2x8x32xf32>
    %69 = tpu.concatenate %62, %64, %66, %68 in 1 : vector<2x8x32xf32>, vector<2x8x32xf32>, vector<2x8x32xf32>, vector<2x8x32xf32> -> vector<2x32x32xf32>
    %70 = vector.extract_strided_slice %58 {offsets = [0, 8], sizes = [16, 8], strides = [1, 1]} : vector<16x64xf32> to vector<16x8xf32>
    %71 = vector.shape_cast %70 : vector<16x8xf32> to vector<2x8x8xf32>
    %72 = vector.extract_strided_slice %58 {offsets = [0, 24], sizes = [16, 8], strides = [1, 1]} : vector<16x64xf32> to vector<16x8xf32>
    %73 = vector.shape_cast %72 : vector<16x8xf32> to vector<2x8x8xf32>
    %74 = vector.extract_strided_slice %58 {offsets = [0, 40], sizes = [16, 8], strides = [1, 1]} : vector<16x64xf32> to vector<16x8xf32>
    %75 = vector.shape_cast %74 : vector<16x8xf32> to vector<2x8x8xf32>
    %76 = vector.extract_strided_slice %58 {offsets = [0, 56], sizes = [16, 8], strides = [1, 1]} : vector<16x64xf32> to vector<16x8xf32>
    %77 = vector.shape_cast %76 : vector<16x8xf32> to vector<2x8x8xf32>
    %78 = tpu.concatenate %71, %73, %75, %77 in 1 : vector<2x8x8xf32>, vector<2x8x8xf32>, vector<2x8x8xf32>, vector<2x8x8xf32> -> vector<2x32x8xf32>
    %79 = vector.shape_cast %53 : vector<16x32xf32> to vector<2x8x32xf32>
    %80 = arith.truncf %79 : vector<2x8x32xf32> to vector<2x8x32xbf16>
    %81 = vector.shape_cast %54 : vector<16x8xf32> to vector<2x8x8xf32>
    %82 = arith.truncf %81 : vector<2x8x8xf32> to vector<2x8x8xbf16>
    %83 = arith.truncf %69 : vector<2x32x32xf32> to vector<2x32x32xbf16>
    "tpu.trace_start"() <{level = 10 : i32, message = "bmc,btc->bmt"}> : () -> ()
    %cst_25 = arith.constant dense<0.000000e+00> : vector<2x32x8xf32>
    %84 = tpu.matmul %83, %80, %cst_25 {dimension_numbers = #tpu.dot_dimension_numbers<[2], [2], [1], [1], [0, 0, 0, 1, 1, 1], [0], [0]>} : vector<2x32x32xbf16>, vector<2x8x32xbf16>, vector<2x32x8xf32> -> vector<2x32x8xf32>
    "tpu.trace_stop"() : () -> ()
    %85 = arith.truncf %78 : vector<2x32x8xf32> to vector<2x32x8xbf16>
    "tpu.trace_start"() <{level = 10 : i32, message = "bmr,btr->bmt"}> : () -> ()
    %cst_26 = arith.constant dense<0.000000e+00> : vector<2x32x8xf32>
    %86 = tpu.matmul %85, %82, %cst_26 {dimension_numbers = #tpu.dot_dimension_numbers<[2], [2], [1], [1], [0, 0, 0, 1, 1, 1], [0], [0]>} : vector<2x32x8xbf16>, vector<2x8x8xbf16>, vector<2x32x8xf32> -> vector<2x32x8xf32>
    "tpu.trace_stop"() : () -> ()
    %87 = arith.addf %84, %86 : vector<2x32x8xf32>
    %cst_27 = arith.constant 2.500000e-01 : f32
    %88 = vector.broadcast %cst_27 : f32 to vector<2x32x8xf32>
    %89 = arith.mulf %87, %88 : vector<2x32x8xf32>
    %cst_28 = arith.constant dense<0xFF800000> : vector<2x32xf32>
    %90 = vector.multi_reduction <maximumf>, %89, %cst_28 [2] : vector<2x32x8xf32> to vector<2x32xf32>
    %91 = vector.shape_cast %90 : vector<2x32xf32> to vector<2x32x1xf32>
    %92 = vector.broadcast %91 : vector<2x32x1xf32> to vector<2x32x8xf32>
    %93 = arith.subf %89, %92 : vector<2x32x8xf32>
    %94 = math.exp %93 : vector<2x32x8xf32>
    %cst_29 = arith.constant dense<0.000000e+00> : vector<2x32xf32>
    %95 = vector.multi_reduction <add>, %94, %cst_29 [2] : vector<2x32x8xf32> to vector<2x32xf32>
    %96 = vector.shape_cast %95 : vector<2x32xf32> to vector<2x32x1xf32>
    %97 = tpu.reciprocal %96 {approx = true} : vector<2x32x1xf32> -> vector<2x32x1xf32>
    %98 = vector.broadcast %97 : vector<2x32x1xf32> to vector<2x32x8xf32>
    %99 = arith.mulf %94, %98 : vector<2x32x8xf32>
    %100 = arith.truncf %99 : vector<2x32x8xf32> to vector<2x32x8xbf16>
    "tpu.trace_start"() <{level = 10 : i32, message = "bmt,btc->bmc"}> : () -> ()
    %cst_30 = arith.constant dense<0.000000e+00> : vector<2x32x32xf32>
    %101 = tpu.matmul %100, %80, %cst_30 {dimension_numbers = #tpu.dot_dimension_numbers<[2], [1], [1], [2], [0, 0, 0, 1, 1, 2], [0], [0]>} : vector<2x32x8xbf16>, vector<2x8x32xbf16>, vector<2x32x32xf32> -> vector<2x32x32xf32>
    "tpu.trace_stop"() : () -> ()
    %102 = vector.extract_strided_slice %101 {offsets = [0, 0, 0], sizes = [2, 8, 32], strides = [1, 1, 1]} : vector<2x32x32xf32> to vector<2x8x32xf32>
    %103 = vector.extract_strided_slice %101 {offsets = [0, 8, 0], sizes = [2, 8, 32], strides = [1, 1, 1]} : vector<2x32x32xf32> to vector<2x8x32xf32>
    %104 = vector.extract_strided_slice %101 {offsets = [0, 16, 0], sizes = [2, 8, 32], strides = [1, 1, 1]} : vector<2x32x32xf32> to vector<2x8x32xf32>
    %105 = vector.extract_strided_slice %101 {offsets = [0, 24, 0], sizes = [2, 8, 32], strides = [1, 1, 1]} : vector<2x32x32xf32> to vector<2x8x32xf32>
    %106 = tpu.concatenate %102, %103, %104, %105 in 2 : vector<2x8x32xf32>, vector<2x8x32xf32>, vector<2x8x32xf32>, vector<2x8x32xf32> -> vector<2x8x128xf32>
    %107 = vector.shape_cast %106 : vector<2x8x128xf32> to vector<16x128xf32>
    %108 = arith.truncf %107 : vector<16x128xf32> to vector<16x128xbf16>
    %cst_31 = arith.constant dense<0.000000e+00> : vector<16x64xf32>
    %109 = tpu.matmul %108, %10, %cst_31 {dimension_numbers = #tpu.dot_dimension_numbers<[1], [0], [0], [1], [0, 0, 1, 1], [], []>} : vector<16x128xbf16>, vector<128x64xbf16>, vector<16x64xf32> -> vector<16x64xf32>
    %110 = arith.truncf %109 : vector<16x64xf32> to vector<16x64xbf16>
    %cst_32 = arith.constant dense<0.000000e+00> : vector<16x32xf32>
    %111 = tpu.matmul %110, %11, %cst_32 {dimension_numbers = #tpu.dot_dimension_numbers<[1], [1], [0], [0], [0, 0, 1, 0], [], []>} : vector<16x64xbf16>, vector<32x64xbf16>, vector<16x32xf32> -> vector<16x32xf32>
    %112 = vector.broadcast %6 : vector<1x32xf32> to vector<16x32xf32>
    %113 = arith.addf %111, %112 : vector<16x32xf32>
    %114 = arith.addf %0, %113 : vector<16x32xf32>
    %c0_33 = arith.constant 0 : index
    %c0_34 = arith.constant 0 : index
    %115 = vector.load %arg3[%c0_33, %c0_34] : memref<8x128xf32, #tpu.memory_space<vmem>>, vector<1x32xf32>
    %c1_35 = arith.constant 1 : index
    %c0_36 = arith.constant 0 : index
    %116 = vector.load %arg3[%c1_35, %c0_36] : memref<8x128xf32, #tpu.memory_space<vmem>>, vector<1x32xf32>
    %c2_37 = arith.constant 2 : index
    %c0_38 = arith.constant 0 : index
    %117 = vector.load %arg3[%c2_37, %c0_38] : memref<8x128xf32, #tpu.memory_space<vmem>>, vector<1x32xf32>
    %c3_39 = arith.constant 3 : index
    %c0_40 = arith.constant 0 : index
    %118 = vector.load %arg3[%c3_39, %c0_40] : memref<8x128xf32, #tpu.memory_space<vmem>>, vector<1x80xf32>
    %c4_41 = arith.constant 4 : index
    %c0_42 = arith.constant 0 : index
    %119 = vector.load %arg3[%c4_41, %c0_42] : memref<8x128xf32, #tpu.memory_space<vmem>>, vector<1x64xf32>
    %c5_43 = arith.constant 5 : index
    %c0_44 = arith.constant 0 : index
    %120 = vector.load %arg3[%c5_43, %c0_44] : memref<8x128xf32, #tpu.memory_space<vmem>>, vector<1x32xf32>
    %c0_45 = arith.constant 0 : index
    %c0_46 = arith.constant 0 : index
    %121 = vector.load %arg4[%c0_45, %c0_46] : memref<368x128xbf16, #tpu.memory_space<vmem>>, vector<80x32xbf16>
    %c80_47 = arith.constant 80 : index
    %c0_48 = arith.constant 0 : index
    %122 = vector.load %arg4[%c80_47, %c0_48] : memref<368x128xbf16, #tpu.memory_space<vmem>>, vector<64x32xbf16>
    %c144_49 = arith.constant 144 : index
    %c0_50 = arith.constant 0 : index
    %123 = vector.load %arg4[%c144_49, %c0_50] : memref<368x128xbf16, #tpu.memory_space<vmem>>, vector<64x128xbf16>
    %c208_51 = arith.constant 208 : index
    %c0_52 = arith.constant 0 : index
    %124 = vector.load %arg4[%c208_51, %c0_52] : memref<368x128xbf16, #tpu.memory_space<vmem>>, vector<128x64xbf16>
    %c336_53 = arith.constant 336 : index
    %c0_54 = arith.constant 0 : index
    %125 = vector.load %arg4[%c336_53, %c0_54] : memref<368x128xbf16, #tpu.memory_space<vmem>>, vector<32x64xbf16>
    %126 = arith.mulf %114, %114 : vector<16x32xf32>
    %cst_55 = arith.constant dense<0.000000e+00> : vector<16xf32>
    %127 = vector.multi_reduction <add>, %126, %cst_55 [1] : vector<16x32xf32> to vector<16xf32>
    %128 = vector.shape_cast %127 : vector<16xf32> to vector<16x1xf32>
    %cst_56 = arith.constant 3.200000e+01 : f32
    %129 = vector.broadcast %cst_56 : f32 to vector<16x1xf32>
    %130 = arith.divf %128, %129 : vector<16x1xf32>
    %cst_57 = arith.constant 9.99999997E-7 : f32
    %131 = vector.broadcast %cst_57 : f32 to vector<16x1xf32>
    %132 = arith.addf %130, %131 : vector<16x1xf32>
    %133 = math.rsqrt %132 : vector<16x1xf32>
    %134 = vector.broadcast %133 : vector<16x1xf32> to vector<16x32xf32>
    %135 = arith.mulf %114, %134 : vector<16x32xf32>
    %136 = vector.broadcast %115 : vector<1x32xf32> to vector<16x32xf32>
    %137 = arith.mulf %135, %136 : vector<16x32xf32>
    %138 = arith.truncf %137 : vector<16x32xf32> to vector<16x32xbf16>
    %cst_58 = arith.constant dense<0.000000e+00> : vector<16x80xf32>
    %139 = tpu.matmul %138, %121, %cst_58 {dimension_numbers = #tpu.dot_dimension_numbers<[1], [1], [0], [0], [0, 0, 1, 0], [], []>} : vector<16x32xbf16>, vector<80x32xbf16>, vector<16x80xf32> -> vector<16x80xf32>
    %140 = vector.broadcast %118 : vector<1x80xf32> to vector<16x80xf32>
    %141 = arith.addf %139, %140 : vector<16x80xf32>
    %142 = vector.extract_strided_slice %141 {offsets = [0, 0], sizes = [16, 32], strides = [1, 1]} : vector<16x80xf32> to vector<16x32xf32>
    %143 = arith.mulf %142, %142 : vector<16x32xf32>
    %cst_59 = arith.constant dense<0.000000e+00> : vector<16xf32>
    %144 = vector.multi_reduction <add>, %143, %cst_59 [1] : vector<16x32xf32> to vector<16xf32>
    %145 = vector.shape_cast %144 : vector<16xf32> to vector<16x1xf32>
    %cst_60 = arith.constant 3.200000e+01 : f32
    %146 = vector.broadcast %cst_60 : f32 to vector<16x1xf32>
    %147 = arith.divf %145, %146 : vector<16x1xf32>
    %cst_61 = arith.constant 9.99999997E-7 : f32
    %148 = vector.broadcast %cst_61 : f32 to vector<16x1xf32>
    %149 = arith.addf %147, %148 : vector<16x1xf32>
    %150 = math.rsqrt %149 : vector<16x1xf32>
    %151 = vector.broadcast %150 : vector<16x1xf32> to vector<16x32xf32>
    %152 = arith.mulf %142, %151 : vector<16x32xf32>
    %153 = vector.broadcast %116 : vector<1x32xf32> to vector<16x32xf32>
    %154 = arith.mulf %152, %153 : vector<16x32xf32>
    %155 = vector.extract_strided_slice %141 {offsets = [0, 32], sizes = [16, 32], strides = [1, 1]} : vector<16x80xf32> to vector<16x32xf32>
    %156 = arith.mulf %155, %155 : vector<16x32xf32>
    %cst_62 = arith.constant dense<0.000000e+00> : vector<16xf32>
    %157 = vector.multi_reduction <add>, %156, %cst_62 [1] : vector<16x32xf32> to vector<16xf32>
    %158 = vector.shape_cast %157 : vector<16xf32> to vector<16x1xf32>
    %cst_63 = arith.constant 3.200000e+01 : f32
    %159 = vector.broadcast %cst_63 : f32 to vector<16x1xf32>
    %160 = arith.divf %158, %159 : vector<16x1xf32>
    %cst_64 = arith.constant 9.99999997E-7 : f32
    %161 = vector.broadcast %cst_64 : f32 to vector<16x1xf32>
    %162 = arith.addf %160, %161 : vector<16x1xf32>
    %163 = math.rsqrt %162 : vector<16x1xf32>
    %164 = vector.broadcast %163 : vector<16x1xf32> to vector<16x32xf32>
    %165 = arith.mulf %155, %164 : vector<16x32xf32>
    %166 = vector.broadcast %117 : vector<1x32xf32> to vector<16x32xf32>
    %167 = arith.mulf %165, %166 : vector<16x32xf32>
    %168 = vector.extract_strided_slice %141 {offsets = [0, 64], sizes = [16, 8], strides = [1, 1]} : vector<16x80xf32> to vector<16x8xf32>
    %169 = arith.truncf %154 : vector<16x32xf32> to vector<16x32xbf16>
    %cst_65 = arith.constant dense<0.000000e+00> : vector<16x64xf32>
    %170 = tpu.matmul %169, %122, %cst_65 {dimension_numbers = #tpu.dot_dimension_numbers<[1], [1], [0], [0], [0, 0, 1, 0], [], []>} : vector<16x32xbf16>, vector<64x32xbf16>, vector<16x64xf32> -> vector<16x64xf32>
    %171 = vector.broadcast %119 : vector<1x64xf32> to vector<16x64xf32>
    %172 = arith.addf %170, %171 : vector<16x64xf32>
    %173 = arith.truncf %172 : vector<16x64xf32> to vector<16x64xbf16>
    %cst_66 = arith.constant dense<0.000000e+00> : vector<16x128xf32>
    %174 = tpu.matmul %173, %123, %cst_66 {dimension_numbers = #tpu.dot_dimension_numbers<[1], [0], [0], [1], [0, 0, 1, 1], [], []>} : vector<16x64xbf16>, vector<64x128xbf16>, vector<16x128xf32> -> vector<16x128xf32>
    %175 = vector.extract_strided_slice %174 {offsets = [0, 0], sizes = [16, 32], strides = [1, 1]} : vector<16x128xf32> to vector<16x32xf32>
    %176 = vector.shape_cast %175 : vector<16x32xf32> to vector<2x8x32xf32>
    %177 = vector.extract_strided_slice %174 {offsets = [0, 32], sizes = [16, 32], strides = [1, 1]} : vector<16x128xf32> to vector<16x32xf32>
    %178 = vector.shape_cast %177 : vector<16x32xf32> to vector<2x8x32xf32>
    %179 = vector.extract_strided_slice %174 {offsets = [0, 64], sizes = [16, 32], strides = [1, 1]} : vector<16x128xf32> to vector<16x32xf32>
    %180 = vector.shape_cast %179 : vector<16x32xf32> to vector<2x8x32xf32>
    %181 = vector.extract_strided_slice %174 {offsets = [0, 96], sizes = [16, 32], strides = [1, 1]} : vector<16x128xf32> to vector<16x32xf32>
    %182 = vector.shape_cast %181 : vector<16x32xf32> to vector<2x8x32xf32>
    %183 = tpu.concatenate %176, %178, %180, %182 in 1 : vector<2x8x32xf32>, vector<2x8x32xf32>, vector<2x8x32xf32>, vector<2x8x32xf32> -> vector<2x32x32xf32>
    %184 = vector.extract_strided_slice %172 {offsets = [0, 8], sizes = [16, 8], strides = [1, 1]} : vector<16x64xf32> to vector<16x8xf32>
    %185 = vector.shape_cast %184 : vector<16x8xf32> to vector<2x8x8xf32>
    %186 = vector.extract_strided_slice %172 {offsets = [0, 24], sizes = [16, 8], strides = [1, 1]} : vector<16x64xf32> to vector<16x8xf32>
    %187 = vector.shape_cast %186 : vector<16x8xf32> to vector<2x8x8xf32>
    %188 = vector.extract_strided_slice %172 {offsets = [0, 40], sizes = [16, 8], strides = [1, 1]} : vector<16x64xf32> to vector<16x8xf32>
    %189 = vector.shape_cast %188 : vector<16x8xf32> to vector<2x8x8xf32>
    %190 = vector.extract_strided_slice %172 {offsets = [0, 56], sizes = [16, 8], strides = [1, 1]} : vector<16x64xf32> to vector<16x8xf32>
    %191 = vector.shape_cast %190 : vector<16x8xf32> to vector<2x8x8xf32>
    %192 = tpu.concatenate %185, %187, %189, %191 in 1 : vector<2x8x8xf32>, vector<2x8x8xf32>, vector<2x8x8xf32>, vector<2x8x8xf32> -> vector<2x32x8xf32>
    %193 = vector.shape_cast %167 : vector<16x32xf32> to vector<2x8x32xf32>
    %194 = arith.truncf %193 : vector<2x8x32xf32> to vector<2x8x32xbf16>
    %195 = vector.shape_cast %168 : vector<16x8xf32> to vector<2x8x8xf32>
    %196 = arith.truncf %195 : vector<2x8x8xf32> to vector<2x8x8xbf16>
    %197 = arith.truncf %183 : vector<2x32x32xf32> to vector<2x32x32xbf16>
    "tpu.trace_start"() <{level = 10 : i32, message = "bmc,btc->bmt"}> : () -> ()
    %cst_67 = arith.constant dense<0.000000e+00> : vector<2x32x8xf32>
    %198 = tpu.matmul %197, %194, %cst_67 {dimension_numbers = #tpu.dot_dimension_numbers<[2], [2], [1], [1], [0, 0, 0, 1, 1, 1], [0], [0]>} : vector<2x32x32xbf16>, vector<2x8x32xbf16>, vector<2x32x8xf32> -> vector<2x32x8xf32>
    "tpu.trace_stop"() : () -> ()
    %199 = arith.truncf %192 : vector<2x32x8xf32> to vector<2x32x8xbf16>
    "tpu.trace_start"() <{level = 10 : i32, message = "bmr,btr->bmt"}> : () -> ()
    %cst_68 = arith.constant dense<0.000000e+00> : vector<2x32x8xf32>
    %200 = tpu.matmul %199, %196, %cst_68 {dimension_numbers = #tpu.dot_dimension_numbers<[2], [2], [1], [1], [0, 0, 0, 1, 1, 1], [0], [0]>} : vector<2x32x8xbf16>, vector<2x8x8xbf16>, vector<2x32x8xf32> -> vector<2x32x8xf32>
    "tpu.trace_stop"() : () -> ()
    %201 = arith.addf %198, %200 : vector<2x32x8xf32>
    %cst_69 = arith.constant 2.500000e-01 : f32
    %202 = vector.broadcast %cst_69 : f32 to vector<2x32x8xf32>
    %203 = arith.mulf %201, %202 : vector<2x32x8xf32>
    %cst_70 = arith.constant dense<0xFF800000> : vector<2x32xf32>
    %204 = vector.multi_reduction <maximumf>, %203, %cst_70 [2] : vector<2x32x8xf32> to vector<2x32xf32>
    %205 = vector.shape_cast %204 : vector<2x32xf32> to vector<2x32x1xf32>
    %206 = vector.broadcast %205 : vector<2x32x1xf32> to vector<2x32x8xf32>
    %207 = arith.subf %203, %206 : vector<2x32x8xf32>
    %208 = math.exp %207 : vector<2x32x8xf32>
    %cst_71 = arith.constant dense<0.000000e+00> : vector<2x32xf32>
    %209 = vector.multi_reduction <add>, %208, %cst_71 [2] : vector<2x32x8xf32> to vector<2x32xf32>
    %210 = vector.shape_cast %209 : vector<2x32xf32> to vector<2x32x1xf32>
    %211 = tpu.reciprocal %210 {approx = true} : vector<2x32x1xf32> -> vector<2x32x1xf32>
    %212 = vector.broadcast %211 : vector<2x32x1xf32> to vector<2x32x8xf32>
    %213 = arith.mulf %208, %212 : vector<2x32x8xf32>
    %214 = arith.truncf %213 : vector<2x32x8xf32> to vector<2x32x8xbf16>
    "tpu.trace_start"() <{level = 10 : i32, message = "bmt,btc->bmc"}> : () -> ()
    %cst_72 = arith.constant dense<0.000000e+00> : vector<2x32x32xf32>
    %215 = tpu.matmul %214, %194, %cst_72 {dimension_numbers = #tpu.dot_dimension_numbers<[2], [1], [1], [2], [0, 0, 0, 1, 1, 2], [0], [0]>} : vector<2x32x8xbf16>, vector<2x8x32xbf16>, vector<2x32x32xf32> -> vector<2x32x32xf32>
    "tpu.trace_stop"() : () -> ()
    %216 = vector.extract_strided_slice %215 {offsets = [0, 0, 0], sizes = [2, 8, 32], strides = [1, 1, 1]} : vector<2x32x32xf32> to vector<2x8x32xf32>
    %217 = vector.extract_strided_slice %215 {offsets = [0, 8, 0], sizes = [2, 8, 32], strides = [1, 1, 1]} : vector<2x32x32xf32> to vector<2x8x32xf32>
    %218 = vector.extract_strided_slice %215 {offsets = [0, 16, 0], sizes = [2, 8, 32], strides = [1, 1, 1]} : vector<2x32x32xf32> to vector<2x8x32xf32>
    %219 = vector.extract_strided_slice %215 {offsets = [0, 24, 0], sizes = [2, 8, 32], strides = [1, 1, 1]} : vector<2x32x32xf32> to vector<2x8x32xf32>
    %220 = tpu.concatenate %216, %217, %218, %219 in 2 : vector<2x8x32xf32>, vector<2x8x32xf32>, vector<2x8x32xf32>, vector<2x8x32xf32> -> vector<2x8x128xf32>
    %221 = vector.shape_cast %220 : vector<2x8x128xf32> to vector<16x128xf32>
    %222 = arith.truncf %221 : vector<16x128xf32> to vector<16x128xbf16>
    %cst_73 = arith.constant dense<0.000000e+00> : vector<16x64xf32>
    %223 = tpu.matmul %222, %124, %cst_73 {dimension_numbers = #tpu.dot_dimension_numbers<[1], [0], [0], [1], [0, 0, 1, 1], [], []>} : vector<16x128xbf16>, vector<128x64xbf16>, vector<16x64xf32> -> vector<16x64xf32>
    %224 = arith.truncf %223 : vector<16x64xf32> to vector<16x64xbf16>
    %cst_74 = arith.constant dense<0.000000e+00> : vector<16x32xf32>
    %225 = tpu.matmul %224, %125, %cst_74 {dimension_numbers = #tpu.dot_dimension_numbers<[1], [1], [0], [0], [0, 0, 1, 0], [], []>} : vector<16x64xbf16>, vector<32x64xbf16>, vector<16x32xf32> -> vector<16x32xf32>
    %226 = vector.broadcast %120 : vector<1x32xf32> to vector<16x32xf32>
    %227 = arith.addf %225, %226 : vector<16x32xf32>
    %228 = arith.addf %114, %227 : vector<16x32xf32>
    %c0_75 = arith.constant 0 : index
    %c0_76 = arith.constant 0 : index
    %229 = vector.load %arg5[%c0_75, %c0_76] : memref<16x32xf32, #tpu.memory_space<vmem>>, vector<16x32xf32>
    tpu.vector_store %arg5[%c0_75, %c0_76], %228 {strides = array<i32>} : memref<16x32xf32, #tpu.memory_space<vmem>>, vector<16x32xf32>,
    return
  }
}

</mosaic_0001>

<bundles_post_ra>
// kernel: transformer_block.1
= control target key start
LH: loop header
LB: loop body
LE: loop exit
PB: predicated region body
PF: predicated region fallthrough
CT: control target
= control target key end

     0   :  { %vm77_vm0 = vcmask 261120   ;;  %v2775_v2 = vmov 0.0   ;;  %vm2776_vm1 = vmmov 0   ;;  %s2777_s13 = smov 96   ;;  %s2778_s16 = smov 32   ;;  %vm348_vm2 = vcmask 523264   ;;  %s3315_s0 = inlined_call_operand.vmem [shape: f32[16,32], index: 0, kind: input, shape index: {}, may-alias: {0,5}]   ;;  %s3316_s2 = inlined_call_operand.vmem [shape: bf16[368,128], index: 2, kind: input, shape index: {}]   ;;  %s3317_s1 = inlined_call_operand.vmem [shape: f32[8,128], index: 1, kind: input, shape index: {}]   ;;  %s3318_s4 = inlined_call_operand.vmem [shape: bf16[368,128], index: 4, kind: input, shape index: {}]   ;;  %s3319_s3 = inlined_call_operand.vmem [shape: f32[8,128], index: 3, kind: input, shape index: {}]   ;;  %s3320_s5 = inlined_call_operand.vmem [shape: f32[16,32], index: 5, kind: output, shape index: {}, may-alias: {0,5}]  }
   0x1   :  { %v21_v0 = vld [vmem:[%s3315_s0] sm:$0xff]  ;;  %v22_v1 = vld [vmem:[%s3315_s0 + $0x8] sm:$0xff]  ;;  %2369 = vmatprep.subr.bf16.mxu0 %v2775_v2  ;;  %2383 = vmatprep.subr.bf16.mxu1 %v2775_v2  ;;  %v2641_v11 = vld [vmem:[%s3316_s2 + $0x10] sm:$0xff]   ;;  %s2779_s10 = smov 112   ;;  %s2780_s11 = smov 80   ;;  %vm454_vm3 = vcmask 64512  }
   0x2   :  { %v75_v3 = vmul.f32 %v21_v0, %v21_v0  ;;  %v76_v4 = vmul.f32 %v22_v1, %v22_v1  ;;  %v2639_v5 = vld [vmem:[%s3316_s2] sm:$0xff]   ;;  %v2640_v6 = vld [vmem:[%s3316_s2 + $0x8] sm:$0xff]   ;;  %v139_v12 = vsel %vm77_vm0, %v2641_v11, 0  ;;  %v2642_v13 = vld [vmem:[%s3316_s2 + $0x18] sm:$0xff]   ;;  %2379 = vmatprep.mubr.msk.bf16.mxu0 %vm2776_vm1, %v2775_v2  ;;  %2391 = vmatprep.mubr.msk.bf16.mxu1 %vm2776_vm1, %v2775_v2  ;;  %s2781_s12 = smov 64   ;;  %s2782_s14 = smov 120  }
   0x3   :  { %v133_v8 = vsel %vm77_vm0, %v2639_v5, 0  ;;  %v136_v10 = vsel %vm77_vm0, %v2640_v6, 0  ;;  %v142_v14 = vsel %vm77_vm0, %v2642_v13, 0  ;;  %v2643_v15 = vld [vmem:[%s3316_s2 + $0x20] sm:$0xff]   ;;  %v2644_v31 = vld [vmem:[%s3316_s2 + $0x28] sm:$0xff]   ;;  %v2645_v45 = vld [vmem:[%s3316_s2 + $0x30] sm:$0xff]  }
   0x4   :  { %v78_v7 = vsel %vm77_vm0, %v75_v3, 0.0  ;;  %v81_v9 = vsel %vm77_vm0, %v76_v4, 0.0  ;;  %2370 = vmatpush3.bf16.xpose.msra.mxu0 %v133_v8  ;;  %v145_v16 = vsel %vm77_vm0, %v2643_v15, 0  ;;  %v2187_v26 = vld [vmem:[%s3317_s1] ss:$0 sm:$0xff]  ;;  %v271_v32 = vsel %vm77_vm0, %v2644_v31, 0 }
   0x5   :  { %79 = vadd.xlane.f32.xlu0 %v78_v7  ;;  %2371 = vmatprep.subr.bf16.mxu0 %v2775_v2  ;;  %v2188_v33 = vld [vmem:[%s3317_s1 + $0x3] ss:$0 sm:$0xff]  ;;  %v2196_v43 = vld [vmem:[%s3317_s1 + $0x2] ss:$0 sm:$0xff]  ;;  %v274_v46 = vsel %vm77_vm0, %v2645_v45, 0  ;;  %v2646_v47 = vld [vmem:[%s3316_s2 + $0x38] sm:$0xff]  }
   0x6   :  { %2384 = vmatpush3.bf16.xpose.msra.mxu1 %v271_v32  ;;  %v277_v48 = vsel %vm77_vm0, %v2646_v47, 0  ;;  %v2647_v49 = vld [vmem:[%s3316_s2 + $0x40] sm:$0xff]   ;;  %v2648_v6 = vld [vmem:[%s3316_s2 + $0x48] sm:$0xff]   ;;  %v2649_v7 = vld [vmem:[%s3316_s2 + $0x50] sm:$0xff]   ;;  %vm808_vm4 = vcmask 1043456   ;;  %vm945_vm5 = vcmask 785408  }
   0x7   :  { %2385 = vmatprep.subr.bf16.mxu1 %v2775_v2  ;;  %v280_v50 = vsel %vm77_vm0, %v2647_v49, 0  ;;  %v2650_v8 = vld [vmem:[%s3316_s2 + $0x58] sm:$0xff]  }
   0x9   :  { %82 = vadd.xlane.f32.xlu0 %v81_v9  ;;  %v2651_v9 = vld [vmem:[%s3316_s2 + $0x60] sm:$0xff]  }
   0xc   :  { %2372 = vmatpush3.bf16.xpose.msra.mxu0 %v136_v10 }
   0xd   :  { %2373 = vmatprep.subr.bf16.mxu0 %v2775_v2 }
   0xe   :  { %2386 = vmatpush3.bf16.xpose.msra.mxu1 %v274_v46 }
   0xf   :  { %2387 = vmatprep.subr.bf16.mxu1 %v2775_v2 }
  0x14   :  { %2374 = vmatpush3.bf16.xpose.msra.mxu0 %v139_v12  ;;  %v2197_v12 = vld [vmem:[%s3317_s1 + $0x4] ss:$0 sm:$0xff] }
  0x15   :  { %2375 = vmatprep.subr.bf16.mxu0 %v2775_v2 }
  0x16   :  { %2388 = vmatpush3.bf16.xpose.msra.mxu1 %v277_v48 }
  0x17   :  { %2389 = vmatprep.subr.bf16.mxu1 %v2775_v2 }
  0x1c   :  { %2376 = vmatpush3.bf16.xpose.msra.mxu0 %v142_v14 }
  0x1d   :  { %2377 = vmatprep.subr.bf16.mxu0 %v2775_v2 }
  0x1e   :  { %2390 = vmatpush3.bf16.xpose.msra.mxu1 %v280_v50 }
  0x1f   :  { %2395 = vmatprep.subr.bf16.mxu1 %v2775_v2 }
  0x24   :  { %2378 = vmatpush3.bf16.xpose.msra.mxu0 %v145_v16 }
  0x92   :  { %v80_v17 = vpop.xlane.xlu0 %79 }
  0x93   :  { %v85_v18 = vmul.f32 0.03125, %v80_v17 }
  0x95   :  { %v87_v19 = vadd.f32 1e-06, %v85_v18 }
  0x96   :  { %v83_v20 = vpop.xlane.xlu0 %82 }
  0x97   :  { %2685 = vrsqrt.f32 %v87_v19  ;;  %v86_v21 = vmul.f32 0.03125, %v83_v20 }
  0x99   :  { %v88_v22 = vadd.f32 1e-06, %v86_v21 }
  0x9b   :  { %2687 = vrsqrt.f32 %v88_v22 }
  0xa1   :  { %v2686_v23 = vpop.eup %2685 }
  0xa2   :  { %v91_v24 = vmul.f32 %v2686_v23, %v21_v0  ;;  %v2195_v0 = vld [vmem:[%s3317_s1 + $0x1] ss:$0 sm:$0xff] }
  0xa4   :  { %v97_v28 = vmul.f32 %v2187_v26, %v91_v24 }
  0xa5   :  { %v2688_v25 = vpop.eup %2687 }
  0xa6   :  { %v92_v27 = vmul.f32 %v2688_v25, %v22_v1 }
  0xa8   :  { %v98_v29 = vmul.f32 %v2187_v26, %v92_v27 }
  0xaa   :  { %v99_v30 = vpack.c.bf16 %v98_v29, %v97_v28 }
  0xac   :  { %2380 = vmatmul.mubr.msk.bf16.vlgmr.msra.gmra.mrb[0].mxu0 %vm77_vm0, %v99_v30 }
 0x17f   :  { %v181_v34 = vpop.f32.mrb[0].mxu0 }
 0x180   :  { %v2863_v35 = vadd.f32 %v2188_v33, %v181_v34  ;;  %v2381_v36 = vpop.f32.mrb[1].mxu0 }
 0x181   :  { %v184_v37 = vpop.f32.mrb[2].mxu0 }
 0x182   :  { %v2865_v38 = vadd.f32 %v2188_v33, %v184_v37  ;;  %v2382_v39 = vpop.f32.mrb[3].mxu0  ;;  %v188_v40 = vmul.f32 %v2863_v35, %v2863_v35  ;;  %v435_v26 = vpack.c.bf16 %v2863_v35, %v2863_v35 }
 0x184   :  { %212 = vrot.lane.b32.xlu0 %v188_v40, %s2777_s13  ;;  %v190_v41 = vsel %vm77_vm0, %v188_v40, 0.0  ;;  %v189_v42 = vmul.f32 %v2865_v38, %v2865_v38  ;;  %v436_v23 = vpack.c.bf16 %v2865_v38, %v2865_v38 }
 0x185   :  { %191 = vadd.xlane.f32.xlu1 %v190_v41 }
 0x186   :  { %v193_v44 = vsel %vm77_vm0, %v189_v42, 0.0 }
 0x188   :  { %237 = vrot.lane.b32.xlu0 %v2196_v43, %s2778_s16 }
 0x189   :  { %194 = vadd.xlane.f32.xlu1 %v193_v44 }
 0x19a   :  { %214 = vrot.lane.b32.xlu1 %v189_v42, %s2777_s13 }
 0x1f6   :  { %v213_v51 = vpop.permute.xlu0 %212 }
 0x1f7   :  { %v218_v52 = vsel %vm77_vm0, %v213_v51, 0.0 }
 0x1f8   :  { %219 = vadd.xlane.f32.xlu1 %v218_v52 }
 0x1fa   :  { %v238_v24 = vpop.permute.xlu0 %237 }
 0x212   :  { %v192_v53 = vpop.xlane.xlu1 %191 }
 0x213   :  { %v196_v54 = vmul.f32 0.03125, %v192_v53 }
 0x215   :  { %v198_v55 = vadd.f32 1e-06, %v196_v54 }
 0x216   :  { %v195_v56 = vpop.xlane.xlu1 %194 }
 0x217   :  { %2689 = vrsqrt.f32 %v198_v55  ;;  %v197_v57 = vmul.f32 0.03125, %v195_v56 }
 0x219   :  { %v199_v58 = vadd.f32 1e-06, %v197_v57 }
 0x21a   :  { %v215_v59 = vpop.permute.xlu1 %214 }
 0x21b   :  { %2691 = vrsqrt.f32 %v199_v58  ;;  %v221_v60 = vsel %vm77_vm0, %v215_v59, 0.0 }
 0x21c   :  { %222 = vadd.xlane.f32.xlu0 %v221_v60 }
 0x221   :  { %v2690_v61 = vpop.eup %2689 }
 0x222   :  { %v202_v62 = vmul.f32 %v2690_v61, %v2863_v35 }
 0x224   :  { %v208_v3 = vmul.f32 %v2195_v0, %v202_v62 }
 0x225   :  { %v2692_v63 = vpop.eup %2691 }
 0x226   :  { %v203_v1 = vmul.f32 %v2692_v63, %v2865_v38 }
 0x228   :  { %v209_v4 = vmul.f32 %v2195_v0, %v203_v1 }
 0x22a   :  { %v242_v5 = vpack.c.bf16 %v209_v4, %v208_v3 }
 0x22c   :  { %2392 = vmatmul.mubr.msk.bf16.vlgmr.msra.gmra.mrb[0].mxu1 %vm77_vm0, %v242_v5 }
 0x22d   :  { %2403 = vmatprep.mubr.msk.bf16.mxu1 %vm2776_vm1, %v2775_v2  ;;  %2396 = vmatpush3.bf16.msra.mxu1 %v2648_v6 }
 0x22e   :  { %2397 = vmatprep.subr.bf16.mxu1 %v2775_v2 }
 0x231   :  { %2398 = vmatpush3.bf16.msra.mxu1 %v2649_v7 }
 0x232   :  { %2399 = vmatprep.subr.bf16.mxu1 %v2775_v2 }
 0x235   :  { %2400 = vmatpush3.bf16.msra.mxu1 %v2650_v8 }
 0x236   :  { %2401 = vmatprep.subr.bf16.mxu1 %v2775_v2 }
 0x239   :  { %2402 = vmatpush3.bf16.msra.mxu1 %v2651_v9 }
 0x285   :  { %v220_v10 = vpop.xlane.xlu1 %219 }
 0x286   :  { %v224_v11 = vmul.f32 0.03125, %v220_v10 }
 0x288   :  { %v226_v16 = vadd.f32 1e-06, %v224_v11 }
 0x28a   :  { %2693 = vrsqrt.f32 %v226_v16 }
 0x294   :  { %v2694_v21 = vpop.eup %2693 }
 0x295   :  { %v230_v22 = vmul.f32 %v2694_v21, %v2863_v35 }
 0x297   :  { %v240_v25 = vmul.f32 %v238_v24, %v230_v22 }
 0x299   :  { %v433_v27 = vpack.c.bf16 %v240_v25, %v240_v25 }
 0x2a9   :  { %v223_v28 = vpop.xlane.xlu0 %222 }
 0x2aa   :  { %v225_v43 = vmul.f32 0.03125, %v223_v28 }
 0x2ac   :  { %v227_v44 = vadd.f32 1e-06, %v225_v43 }
 0x2ae   :  { %2695 = vrsqrt.f32 %v227_v44 }
 0x2b8   :  { %v2696_v45 = vpop.eup %2695 }
 0x2b9   :  { %v231_v46 = vmul.f32 %v2696_v45, %v2865_v38 }
 0x2bb   :  { %v241_v47 = vmul.f32 %v238_v24, %v231_v46 }
 0x2bd   :  { %v434_v52 = vpack.c.bf16 %v241_v47, %v241_v47 }
 0x2ff   :  { %v316_v13 = vpop.f32.mrb[0].mxu1 }
 0x300   :  { %v317_v14 = vadd.f32 %v2197_v12, %v316_v13  ;;  %v2393_v15 = vpop.f32.mrb[1].mxu1 }
 0x301   :  { %v319_v17 = vpop.f32.mrb[2].mxu1 }
 0x302   :  { %v320_v18 = vadd.f32 %v2197_v12, %v319_v17  ;;  %v2394_v19 = vpop.f32.mrb[3].mxu1  ;;  %415 = vrot.lane.b32.xlu0 %v317_v14, %s2779_s10 }
 0x304   :  { %417 = vrot.lane.b32.xlu1 %v320_v18, %s2779_s10  ;;  %v323_v20 = vpack.c.bf16 %v320_v18, %v317_v14 }
 0x306   :  { %2404 = vmatmul.mubr.msk.bf16.vlgmr.msra.gmra.mrb[4].mxu1 %vm348_vm2, %v323_v20  ;;  %427 = vrot.lane.b32.xlu0 %v317_v14, %s2780_s11 }
 0x308   :  { %423 = vrot.lane.b32.xlu1 %v320_v18, %s2777_s13 }
 0x30c   :  { %429 = vrot.lane.b32.xlu1 %v320_v18, %s2780_s11 }
 0x310   :  { %421 = vrot.lane.b32.xlu1 %v317_v14, %s2777_s13 }
 0x314   :  { %520 = vrot.lane.b32.xlu1 %v436_v23, %s2781_s12 }
 0x318   :  { %452 = vrot.lane.b32.xlu1 %v435_v26, %s2781_s12 }
 0x31c   :  { %581 = vrot.lane.b32.xlu1 %v433_v27, %s2777_s13 }
 0x374   :  { %v416_v29 = vpop.permute.xlu0 %415 }
 0x375   :  { %v441_v30 = vpack.c.bf16 %v416_v29, %v317_v14 }
 0x376   :  { %v418_v31 = vpop.permute.xlu1 %417 }
 0x377   :  { %v443_v32 = vpack.c.bf16 %v418_v31, %v320_v18  ;;  %447 = vrot.lane.b32.xlu1 %v441_v30, %s2782_s14 }
 0x378   :  { %v428_v53 = vpop.permute.xlu0 %427 }
 0x379   :  { %515 = vrot.lane.b32.xlu0 %v443_v32, %s2782_s14 }
 0x37a   :  { %v424_v33 = vpop.permute.xlu1 %423 }
 0x37e   :  { %v430_v34 = vpop.permute.xlu1 %429 }
 0x37f   :  { %v444_v36 = vpack.c.bf16 %v430_v34, %v424_v33 }
 0x381   :  { %517 = vrot.lane.b32.xlu0 %v444_v36, %s2782_s14 }
 0x382   :  { %v422_v35 = vpop.permute.xlu1 %421 }
 0x383   :  { %v442_v54 = vpack.c.bf16 %v428_v53, %v422_v35 }
 0x386   :  { %v521_v37 = vpop.permute.xlu1 %520 }
 0x387   :  { %v529_v39 = vsel %vm454_vm3, %v521_v37, 0  ;;  %2590 = vmatprep.subr.msk.bf16.mxu0 %vm454_vm3, %v521_v37 }
 0x388   :  { %2414 = vmatpush3.bf16.xpose.msra.mxu0 %v529_v39 }
 0x38a   :  { %v453_v40 = vpop.permute.xlu1 %452 }
 0x38b   :  { %v462_v41 = vsel %vm454_vm3, %v453_v40, 0  ;;  %2589 = vmatprep.subr.msk.bf16.mxu1 %vm454_vm3, %v453_v40 }
 0x38c   :  { %2408 = vmatpush3.bf16.xpose.msra.mxu1 %v462_v41 }
 0x38e   :  { %v582_v42 = vpop.permute.xlu1 %581 }
 0x38f   :  { %2591 = vmatprep.subr.msk.bf16.mxu0 %vm77_vm0, %v582_v42  ;;  %2593 = vmatprep.subr.msk.bf16.mxu1 %vm808_vm4, %v582_v42  ;;  %v590_v57 = vsel %vm77_vm0, %v582_v42, 0  ;;  %v809_v3 = vsel %vm808_vm4, %v582_v42, 0 }
 0x3d9   :  { %v386_v48 = vpop.f32.mrb[4].mxu1 }
 0x3da   :  { %v2405_v49 = vpop.f32.mrb[5].mxu1  ;;  %401 = vrot.lane.b32.xlu1 %v386_v48, %s2781_s12  ;;  %395 = vrot.lane.b32.xlu0 %v386_v48, %s2777_s13 }
 0x3db   :  { %v389_v50 = vpop.f32.mrb[6].mxu1 }
 0x3dc   :  { %v2406_v51 = vpop.f32.mrb[7].mxu1 }
 0x3de   :  { %642 = vrot.lane.b32.xlu1 %v434_v52, %s2777_s13  ;;  %407 = vrot.lane.b32.xlu0 %v386_v48, %s2778_s16 }
 0x3e2   :  { %403 = vrot.lane.b32.xlu1 %v389_v50, %s2781_s12  ;;  %449 = vrot.lane.b32.xlu0 %v442_v54, %s2782_s14 }
 0x3e6   :  { %397 = vrot.lane.b32.xlu0 %v389_v50, %s2777_s13 }
 0x3e9   :  { %v448_v38 = vpop.permute.xlu1 %447 }
 0x3ea   :  { %409 = vrot.lane.b32.xlu0 %v389_v50, %s2778_s16  ;;  %2409 = vmatprep.mubr.msk.bf16.mxu1 %vm454_vm3, %v448_v38 }
 0x3eb   :  { %v516_v55 = vpop.permute.xlu0 %515 }
 0x3ec   :  { %2415 = vmatprep.mubr.msk.bf16.mxu0 %vm454_vm3, %v516_v55 }
 0x3f3   :  { %v518_v56 = vpop.permute.xlu0 %517 }
 0x3f4   :  { %2416 = vmatmul.mubr.msk.bf16.vlgmr.msra.gmra.mrb[4].mxu0 %vm454_vm3, %v518_v56 }
 0x3f5   :  { %2420 = vmatpush3.bf16.xpose.msra.mxu0 %v590_v57 }
 0x44c   :  { %v396_v58 = vpop.permute.xlu0 %395  ;;  %v402_v59 = vpop.permute.xlu1 %401 }
 0x44d   :  { %v437_v60 = vpack.c.bf16 %v396_v58, %v386_v48 }
 0x44f   :  { %2421 = vmatprep.mubr.msk.bf16.mxu0 %vm77_vm0, %v437_v60 }
 0x450   :  { %v408_v61 = vpop.permute.xlu0 %407  ;;  %v2960_v62 = vpop.permute.xlu1 %642 }
 0x451   :  { %v438_v63 = vpack.c.bf16 %v408_v61, %v402_v59  ;;  %2592 = vmatprep.subr.msk.bf16.mxu0 %vm77_vm0, %v2960_v62  ;;  %v651_v0 = vsel %vm77_vm0, %v2960_v62, 0 }
 0x453   :  { %2422 = vmatmul.mubr.msk.bf16.vlgmr.msra.gmra.mrb[8].mxu0 %vm77_vm0, %v438_v63 }
 0x454   :  { %2426 = vmatpush3.bf16.xpose.msra.mxu0 %v651_v0  ;;  %v450_v1 = vpop.permute.xlu0 %449  ;;  %v404_v6 = vpop.permute.xlu1 %403 }
 0x455   :  { %2410 = vmatmul.mubr.msk.bf16.vlgmr.msra.gmra.mrb[8].mxu1 %vm454_vm3, %v450_v1  ;;  %2463 = vmatprep.subr.bf16.mxu0 %v2775_v2 }
 0x456   :  { %2432 = vmatpush3.bf16.msra.mxu1 %v809_v3 }
 0x457   :  { %2594 = vmatprep.subr.msk.bf16.mxu1 %vm808_vm4, %v2960_v62 }
 0x458   :  { %v398_v4 = vpop.permute.xlu0 %397 }
 0x459   :  { %v439_v5 = vpack.c.bf16 %v398_v4, %v389_v50 }
 0x45b   :  { %2427 = vmatprep.mubr.msk.bf16.mxu0 %vm77_vm0, %v439_v5 }
 0x45c   :  { %v410_v7 = vpop.permute.xlu0 %409 }
 0x45d   :  { %v440_v8 = vpack.c.bf16 %v410_v7, %v404_v6 }
 0x45f   :  { %2428 = vmatmul.mubr.msk.bf16.vlgmr.msra.gmra.mrb[4].mxu0 %vm77_vm0, %v440_v8 }
 0x460   :  { %2467 = vmatprep.mubr.msk.bf16.mxu0 %vm2776_vm1, %v2775_v2 }
 0x526   :  { %v2423_v9 = vpop.f32.mrb[8].mxu0 }
 0x527   :  { %v626_v10 = vpop.f32.mrb[9].mxu0 }
 0x528   :  { %v2411_v11 = vpop.f32.mrb[8].mxu1  ;;  %v2424_v12 = vpop.f32.mrb[10].mxu0 }
 0x529   :  { %v635_v13 = vadd.f32 %v2423_v9, %v2411_v11  ;;  %v498_v14 = vpop.f32.mrb[9].mxu1  ;;  %v629_v15 = vpop.f32.mrb[11].mxu0 }
 0x52a   :  { %v627_v16 = vadd.f32 %v626_v10, %v498_v14  ;;  %v2412_v17 = vpop.f32.mrb[10].mxu1 }
 0x52b   :  { %v704_v18 = vmul.f32 0.25, %v635_v13  ;;  %v638_v19 = vadd.f32 %v2424_v12, %v2412_v17  ;;  %v501_v20 = vpop.f32.mrb[11].mxu1 }
 0x52c   :  { %v702_v21 = vmul.f32 0.25, %v627_v16  ;;  %v630_v22 = vadd.f32 %v629_v15, %v501_v20 }
 0x52d   :  { %v716_v23 = vsel %vm454_vm3, %v704_v18, -inf  ;;  %v705_v27 = vmul.f32 0.25, %v638_v19 }
 0x52e   :  { %v703_v24 = vmul.f32 0.25, %v630_v22  ;;  %717 = vmax.xlane.f32.xlu0 %v716_v23  ;;  %v710_v25 = vsel %vm454_vm3, %v702_v21, -inf }
 0x52f   :  { %711 = vmax.xlane.f32.xlu1 %v710_v25  ;;  %v719_v33 = vsel %vm454_vm3, %v705_v27, -inf }
 0x530   :  { %v713_v26 = vsel %vm454_vm3, %v703_v24, -inf }
 0x532   :  { %v2429_v28 = vpop.f32.mrb[4].mxu0  ;;  %714 = vmax.xlane.f32.xlu0 %v713_v26 }
 0x533   :  { %v687_v29 = vpop.f32.mrb[5].mxu0  ;;  %v708_v34 = vmul.f32 0.25, %v2429_v28 }
 0x534   :  { %v706_v30 = vmul.f32 0.25, %v687_v29  ;;  %v2430_v31 = vpop.f32.mrb[6].mxu0 }
 0x535   :  { %v690_v32 = vpop.f32.mrb[7].mxu0  ;;  %v709_v39 = vmul.f32 0.25, %v2430_v31  ;;  %v728_v40 = vsel %vm454_vm3, %v708_v34, -inf }
 0x536   :  { %v707_v36 = vmul.f32 0.25, %v690_v32  ;;  %720 = vmax.xlane.f32.xlu0 %v719_v33  ;;  %v722_v35 = vsel %vm454_vm3, %v706_v30, -inf }
 0x537   :  { %723 = vmax.xlane.f32.xlu1 %v722_v35  ;;  %v731_v41 = vsel %vm454_vm3, %v709_v39, -inf }
 0x538   :  { %v725_v37 = vsel %vm454_vm3, %v707_v36, -inf }
 0x53a   :  { %726 = vmax.xlane.f32.xlu0 %v725_v37 }
 0x53b   :  { %729 = vmax.xlane.f32.xlu1 %v728_v40  ;;  %v866_v40 = vsel %vm808_vm4, %v2960_v62, 0  ;;  %v2652_v62 = vld [vmem:[%s3316_s2 + $0x68] sm:$0xff]  }
 0x53e   :  { %732 = vmax.xlane.f32.xlu0 %v731_v41 }
 0x5bb   :  { %v718_v42 = vpop.xlane.xlu0 %717 }
 0x5bc   :  { %v736_v43 = vsub.f32 %v704_v18, %v718_v42  ;;  %v712_v44 = vpop.xlane.xlu1 %711 }
 0x5bd   :  { %v734_v45 = vsub.f32 %v702_v21, %v712_v44 }
 0x5be   :  { %v746_v46 = vmul.f32 1.442695, %v736_v43 }
 0x5bf   :  { %v742_v47 = vmul.f32 1.442695, %v734_v45  ;;  %v715_v48 = vpop.xlane.xlu0 %714 }
 0x5c0   :  { %v735_v49 = vsub.f32 %v703_v24, %v715_v48 }
 0x5c1   :  { %2697 = vpow2.f32 %v742_v47 }
 0x5c2   :  { %v744_v50 = vmul.f32 1.442695, %v735_v49  ;;  %2699 = vpow2.f32 %v746_v46  ;;  %v2653_v49 = vld [vmem:[%s3316_s2 + $0x70] sm:$0xff]  }
 0x5c3   :  { %v721_v51 = vpop.xlane.xlu0 %720 }
 0x5c4   :  { %2701 = vpow2.f32 %v744_v50  ;;  %v737_v52 = vsub.f32 %v705_v27, %v721_v51  ;;  %v724_v53 = vpop.xlane.xlu1 %723  ;;  %v2654_v50 = vld [vmem:[%s3316_s2 + $0x78] sm:$0xff]   ;;  %v2655_v51 = vld [vmem:[%s3316_s2 + $0x80] sm:$0xff]  }
 0x5c5   :  { %v738_v54 = vsub.f32 %v706_v30, %v724_v53  ;;  %v2657_v53 = vld [vmem:[%s3316_s2 + $0x90] sm:$0xff]  }
 0x5c6   :  { %v748_v38 = vmul.f32 1.442695, %v737_v52  ;;  %v2656_v52 = vld [vmem:[%s3316_s2 + $0x88] sm:$0xff]  }
 0x5c7   :  { %v750_v55 = vmul.f32 1.442695, %v738_v54  ;;  %v727_v56 = vpop.xlane.xlu0 %726 }
 0x5c8   :  { %2703 = vpow2.f32 %v748_v38  ;;  %v739_v57 = vsub.f32 %v707_v36, %v727_v56  ;;  %v730_v58 = vpop.xlane.xlu1 %729  ;;  %v2658_v56 = vld [vmem:[%s3316_s2 + $0x98] sm:$0xff]  }
 0x5c9   :  { %2705 = vpow2.f32 %v750_v55  ;;  %v740_v59 = vsub.f32 %v708_v34, %v730_v58  ;;  %v2659_v58 = vld [vmem:[%s3316_s2 + $0xa0] sm:$0xff]  }
 0x5ca   :  { %v752_v60 = vmul.f32 1.442695, %v739_v57 }
 0x5cb   :  { %v2698_v61 = vpop.eup %2697  ;;  %v754_v63 = vmul.f32 1.442695, %v740_v59  ;;  %v733_v0 = vpop.xlane.xlu0 %732 }
 0x5cc   :  { %2707 = vpow2.f32 %v752_v60  ;;  %v741_v1 = vsub.f32 %v709_v39, %v733_v0  ;;  %v758_v3 = vsel %vm454_vm3, %v2698_v61, 0.0  ;;  %v2700_v4 = vpop.eup %2699  ;;  %v2660_v0 = vld [vmem:[%s3316_s2 + $0xa8] sm:$0xff]  }
 0x5cd   :  { %2709 = vpow2.f32 %v754_v63  ;;  %759 = vadd.xlane.f32.xlu1 %v758_v3  ;;  %v764_v8 = vsel %vm454_vm3, %v2700_v4, 0.0 }
 0x5ce   :  { %v2702_v5 = vpop.eup %2701  ;;  %v756_v6 = vmul.f32 1.442695, %v741_v1 }
 0x5cf   :  { %v761_v7 = vsel %vm454_vm3, %v2702_v5, 0.0 }
 0x5d0   :  { %2711 = vpow2.f32 %v756_v6  ;;  %762 = vadd.xlane.f32.xlu0 %v761_v7  ;;  %v2661_v6 = vld [vmem:[%s3316_s2 + $0xb0] sm:$0xff]  }
 0x5d1   :  { %765 = vadd.xlane.f32.xlu1 %v764_v8  ;;  %v1060_v7 = vsel %vm348_vm2, %v2661_v6, 0 }
 0x5d2   :  { %v2704_v9 = vpop.eup %2703 }
 0x5d3   :  { %v2706_v10 = vpop.eup %2705  ;;  %v767_v11 = vsel %vm454_vm3, %v2704_v9, 0.0 }
 0x5d4   :  { %768 = vadd.xlane.f32.xlu0 %v767_v11  ;;  %v770_v12 = vsel %vm454_vm3, %v2706_v10, 0.0 }
 0x5d5   :  { %771 = vadd.xlane.f32.xlu1 %v770_v12 }
 0x5d6   :  { %v2708_v13 = vpop.eup %2707 }
 0x5d7   :  { %v2710_v14 = vpop.eup %2709  ;;  %v773_v15 = vsel %vm454_vm3, %v2708_v13, 0.0 }
 0x5d8   :  { %774 = vadd.xlane.f32.xlu0 %v773_v15  ;;  %v776_v16 = vsel %vm454_vm3, %v2710_v14, 0.0 }
 0x5d9   :  { %777 = vadd.xlane.f32.xlu1 %v776_v16 }
 0x5da   :  { %v2712_v17 = vpop.eup %2711 }
 0x5db   :  { %v779_v18 = vsel %vm454_vm3, %v2712_v17, 0.0 }
 0x5dc   :  { %780 = vadd.xlane.f32.xlu0 %v779_v18 }
 0x65a   :  { %v760_v19 = vpop.xlane.xlu1 %759 }
 0x65b   :  { %2713 = vrcp.f32 %v760_v19 }
 0x65d   :  { %v763_v20 = vpop.xlane.xlu0 %762 }
 0x65e   :  { %2715 = vrcp.f32 %v763_v20  ;;  %v766_v21 = vpop.xlane.xlu1 %765 }
 0x65f   :  { %2717 = vrcp.f32 %v766_v21 }
 0x661   :  { %v769_v22 = vpop.xlane.xlu0 %768 }
 0x662   :  { %2719 = vrcp.f32 %v769_v22  ;;  %v772_v23 = vpop.xlane.xlu1 %771 }
 0x663   :  { %2721 = vrcp.f32 %v772_v23 }
 0x665   :  { %v775_v24 = vpop.xlane.xlu0 %774  ;;  %v2714_v25 = vpop.eup %2713 }
 0x666   :  { %2723 = vrcp.f32 %v775_v24  ;;  %v778_v26 = vpop.xlane.xlu1 %777  ;;  %v790_v29 = vmul.f32 %v2714_v25, %v2698_v61 }
 0x667   :  { %2725 = vrcp.f32 %v778_v26 }
 0x668   :  { %v2716_v27 = vpop.eup %2715 }
 0x669   :  { %v781_v28 = vpop.xlane.xlu0 %780  ;;  %v791_v30 = vmul.f32 %v2716_v27, %v2702_v5  ;;  %v2718_v31 = vpop.eup %2717  ;;  %v1057_v5 = vsel %vm348_vm2, %v2660_v0, 0 }
 0x66a   :  { %2727 = vrcp.f32 %v781_v28  ;;  %v792_v34 = vmul.f32 %v2718_v31, %v2700_v4  ;;  %2464 = vmatpush3.bf16.xpose.msra.mxu0 %v1057_v5  ;;  %v2667_v5 = vld [vmem:[%s3318_s4 + $0x28] sm:$0xff]  }
 0x66b   :  { %v798_v32 = vpack.c.bf16 %v791_v30, %v790_v29  ;;  %2465 = vmatprep.subr.bf16.mxu0 %v2775_v2  ;;  %v2662_v29 = vld [vmem:[%s3318_s4] sm:$0xff]   ;;  %v2663_v30 = vld [vmem:[%s3318_s4 + $0x8] sm:$0xff]   ;;  %v1351_v6 = vsel %vm77_vm0, %v2667_v5, 0 }
 0x66c   :  { %v2720_v33 = vpop.eup %2719  ;;  %v1213_v31 = vsel %vm77_vm0, %v2662_v29, 0 }
 0x66d   :  { %v793_v36 = vmul.f32 %v2720_v33, %v2704_v9  ;;  %2433 = vmatprep.mubr.msk.bf16.mxu1 %vm454_vm3, %v798_v32  ;;  %v2722_v35 = vpop.eup %2721  ;;  %v1216_v32 = vsel %vm77_vm0, %v2663_v30, 0  ;;  %v2228_v33 = vld [vmem:[%s3317_s1 + $0x5] ss:$0 sm:$0xff] }
 0x66e   :  { %v794_v41 = vmul.f32 %v2722_v35, %v2706_v10 }
 0x66f   :  { %v799_v37 = vpack.c.bf16 %v793_v36, %v792_v34 }
 0x670   :  { %v2724_v39 = vpop.eup %2723 }
 0x671   :  { %2434 = vmatmul.mubr.msk.bf16.vlgmr.msra.gmra.mrb[12].mxu1 %vm454_vm3, %v799_v37  ;;  %v795_v42 = vmul.f32 %v2724_v39, %v2708_v13  ;;  %v2726_v43 = vpop.eup %2725  ;;  %v2773_v39 = vld [vmem:[%s3315_s0] sm:$0xff] }
 0x672   :  { %2438 = vmatpush3.bf16.msra.mxu1 %v866_v40  ;;  %v796_v46 = vmul.f32 %v2726_v43, %v2710_v14  ;;  %2466 = vmatpush3.bf16.xpose.msra.mxu0 %v1060_v7  ;;  %v2774_v43 = vld [vmem:[%s3315_s0 + $0x8] sm:$0xff]  ;;  %v2233_v7 = vld [vmem:[%s3319_s3 + $0x3] ss:$0 sm:$0xff] }
 0x673   :  { %v800_v44 = vpack.c.bf16 %v795_v42, %v794_v41  ;;  %2443 = vmatprep.subr.bf16.mxu1 %v2775_v2  ;;  %2471 = vmatprep.subr.bf16.mxu0 %v2775_v2 }
 0x674   :  { %v2728_v45 = vpop.eup %2727 }
 0x675   :  { %v797_v47 = vmul.f32 %v2728_v45, %v2712_v17  ;;  %2439 = vmatprep.mubr.msk.bf16.mxu1 %vm454_vm3, %v800_v44 }
 0x677   :  { %v801_v48 = vpack.c.bf16 %v797_v47, %v796_v46 }
 0x679   :  { %2440 = vmatmul.mubr.msk.bf16.vlgmr.msra.gmra.mrb[16].mxu1 %vm454_vm3, %v801_v48 }
 0x67a   :  { %2459 = vmatprep.mubr.msk.bf16.mxu1 %vm2776_vm1, %v2775_v2  ;;  %2444 = vmatpush3.bf16.msra.mxu1 %v2652_v62  ;;  %v2664_v62 = vld [vmem:[%s3318_s4 + $0x10] sm:$0xff]  }
 0x67b   :  { %2445 = vmatprep.subr.bf16.mxu1 %v2775_v2 }
 0x67e   :  { %2446 = vmatpush3.bf16.msra.mxu1 %v2653_v49  ;;  %v1219_v49 = vsel %vm77_vm0, %v2664_v62, 0  ;;  %v2242_v62 = vld [vmem:[%s3319_s3 + $0x4] ss:$0 sm:$0xff] }
 0x67f   :  { %2447 = vmatprep.subr.bf16.mxu1 %v2775_v2 }
 0x682   :  { %2448 = vmatpush3.bf16.msra.mxu1 %v2654_v50  ;;  %v2665_v50 = vld [vmem:[%s3318_s4 + $0x18] sm:$0xff]  }
 0x683   :  { %2449 = vmatprep.subr.bf16.mxu1 %v2775_v2 }
 0x686   :  { %2450 = vmatpush3.bf16.msra.mxu1 %v2655_v51  ;;  %v1222_v51 = vsel %vm77_vm0, %v2665_v50, 0 }
 0x687   :  { %2451 = vmatprep.subr.bf16.mxu1 %v2775_v2 }
 0x68a   :  { %2452 = vmatpush3.bf16.msra.mxu1 %v2656_v52  ;;  %v2666_v52 = vld [vmem:[%s3318_s4 + $0x20] sm:$0xff]  }
 0x68b   :  { %2453 = vmatprep.subr.bf16.mxu1 %v2775_v2 }
 0x68e   :  { %2454 = vmatpush3.bf16.msra.mxu1 %v2657_v53  ;;  %v1225_v53 = vsel %vm77_vm0, %v2666_v52, 0 }
 0x68f   :  { %2455 = vmatprep.subr.bf16.mxu1 %v2775_v2 }
 0x692   :  { %2456 = vmatpush3.bf16.msra.mxu1 %v2658_v56 }
 0x693   :  { %2457 = vmatprep.subr.bf16.mxu1 %v2775_v2 }
 0x696   :  { %2458 = vmatpush3.bf16.msra.mxu1 %v2659_v58 }
 0x697   :  { %2485 = vmatprep.subr.bf16.mxu1 %v2775_v2 }
 0x744   :  { %v2435_v54 = vpop.f32.mrb[12].mxu1 }
 0x745   :  { %v845_v38 = vpop.f32.mrb[13].mxu1 }
 0x746   :  { %v2436_v55 = vpop.f32.mrb[14].mxu1 }
 0x747   :  { %v848_v57 = vpop.f32.mrb[15].mxu1 }
 0x74c   :  { %v2441_v59 = vpop.f32.mrb[16].mxu1 }
 0x74d   :  { %v2609_v60 = vpack.i.bf16 %v2441_v59, %v2435_v54  ;;  %v902_v61 = vpop.f32.mrb[17].mxu1 }
 0x74e   :  { %v2442_v63 = vpop.f32.mrb[18].mxu1 }
 0x74f   :  { %v2619_v1 = vpack.i.bf16 %v2442_v63, %v2436_v55  ;;  %2610 = vrot.lane.b32.xlu0 %v2609_v60, %s2781_s12  ;;  %v905_v3 = vpop.f32.mrb[19].mxu1  ;;  %v2232_v63 = vld [vmem:[%s3319_s3] ss:$0 sm:$0xff] }
 0x750   :  { %v2614_v4 = vpack.i.bf16 %v905_v3, %v848_v57 }
 0x752   :  { %2615 = vrot.lane.b32.xlu1 %v2614_v4, %s2778_s16 }
 0x756   :  { %2620 = vrot.lane.b32.xlu1 %v2619_v1, %s2777_s13 }
 0x7c1   :  { %v2611_v9 = vpop.permute.xlu0 %2610 }
 0x7c2   :  { %v2613_v14 = vunpack.i.h.bf16 %v2611_v9  ;;  %v2612_v15 = vunpack.i.l.bf16 %v2611_v9 }
 0x7c4   :  { %v2616_v8 = vpop.permute.xlu1 %2615 }
 0x7c5   :  { %v2618_v10 = vunpack.i.h.bf16 %v2616_v8  ;;  %v2617_v11 = vunpack.i.l.bf16 %v2616_v8 }
 0x7c7   :  { %v942_v12 = vsel %vm77_vm0, %v902_v61, %v2618_v10  ;;  %v941_v13 = vsel %vm77_vm0, %v845_v38, %v2617_v11 }
 0x7c8   :  { %v2621_v16 = vpop.permute.xlu1 %2620  ;;  %v943_v19 = vsel %vm348_vm2, %v941_v13, %v2612_v15  ;;  %v944_v20 = vsel %vm348_vm2, %v942_v12, %v2613_v14 }
 0x7c9   :  { %v2623_v17 = vunpack.i.h.bf16 %v2621_v16  ;;  %v2622_v18 = vunpack.i.l.bf16 %v2621_v16 }
 0x7cb   :  { %v946_v21 = vsel %vm945_vm5, %v943_v19, %v2622_v18  ;;  %v947_v22 = vsel %vm945_vm5, %v944_v20, %v2623_v17  ;;  %v2668_v18 = vld [vmem:[%s3318_s4 + $0x30] sm:$0xff]   ;;  %v2669_v20 = vld [vmem:[%s3318_s4 + $0x38] sm:$0xff]  }
 0x7cc   :  { %v948_v23 = vpack.c.bf16 %v947_v22, %v946_v21  ;;  %v1354_v19 = vsel %vm77_vm0, %v2668_v18, 0  ;;  %v1357_v21 = vsel %vm77_vm0, %v2669_v20, 0  ;;  %v2670_v22 = vld [vmem:[%s3318_s4 + $0x40] sm:$0xff]  }
 0x7ce   :  { %2460 = vmatmul.mubr.bf16.vlgmr.msra.gmra.mrb[20].mxu1 %v948_v23  ;;  %v1360_v23 = vsel %vm77_vm0, %v2670_v22, 0 }
 0x7cf   :  { %2493 = vmatprep.mubr.msk.bf16.mxu1 %vm2776_vm1, %v2775_v2  ;;  %2486 = vmatpush3.bf16.xpose.msra.mxu1 %v1351_v6 }
 0x7d0   :  { %2487 = vmatprep.subr.bf16.mxu1 %v2775_v2 }
 0x7d7   :  { %2488 = vmatpush3.bf16.xpose.msra.mxu1 %v1354_v19 }
 0x7d8   :  { %2489 = vmatprep.subr.bf16.mxu1 %v2775_v2 }
 0x7df   :  { %2490 = vmatpush3.bf16.xpose.msra.mxu1 %v1357_v21 }
 0x7e0   :  { %2491 = vmatprep.subr.bf16.mxu1 %v2775_v2 }
 0x7e7   :  { %2492 = vmatpush3.bf16.xpose.msra.mxu1 %v1360_v23 }
 0x8a1   :  { %v1031_v24 = vpop.f32.mrb[20].mxu1 }
 0x8a2   :  { %v2461_v25 = vpop.f32.mrb[21].mxu1 }
 0x8a3   :  { %v1034_v26 = vpop.f32.mrb[22].mxu1 }
 0x8a4   :  { %v1038_v27 = vpack.c.bf16 %v1034_v26, %v1031_v24  ;;  %v2462_v28 = vpop.f32.mrb[23].mxu1 }
 0x8a6   :  { %2468 = vmatmul.mubr.msk.bf16.vlgmr.msra.gmra.mrb[12].mxu0 %vm348_vm2, %v1038_v27 }
 0x8a7   :  { %2481 = vmatprep.mubr.msk.bf16.mxu0 %vm2776_vm1, %v2775_v2  ;;  %2472 = vmatpush3.bf16.xpose.msra.mxu0 %v1213_v31 }
 0x8a8   :  { %2473 = vmatprep.subr.bf16.mxu0 %v2775_v2 }
 0x8af   :  { %2474 = vmatpush3.bf16.xpose.msra.mxu0 %v1216_v32 }
 0x8b0   :  { %2475 = vmatprep.subr.bf16.mxu0 %v2775_v2 }
 0x8b7   :  { %2476 = vmatpush3.bf16.xpose.msra.mxu0 %v1219_v49 }
 0x8b8   :  { %2477 = vmatprep.subr.bf16.mxu0 %v2775_v2 }
 0x8bf   :  { %2478 = vmatpush3.bf16.xpose.msra.mxu0 %v1222_v51 }
 0x8c0   :  { %2479 = vmatprep.subr.bf16.mxu0 %v2775_v2 }
 0x8c7   :  { %2480 = vmatpush3.bf16.xpose.msra.mxu0 %v1225_v53 }
 0x8c8   :  { %2497 = vmatprep.subr.bf16.mxu0 %v2775_v2 }
 0x979   :  { %v1096_v34 = vpop.f32.mrb[12].mxu0 }
 0x97a   :  { %v1097_v36 = vadd.f32 %v2228_v33, %v1096_v34  ;;  %v2469_v35 = vpop.f32.mrb[13].mxu0 }
 0x97b   :  { %v1099_v37 = vpop.f32.mrb[14].mxu0 }
 0x97c   :  { %v3073_v40 = vadd.f32 %v2773_v39, %v1097_v36  ;;  %v1100_v41 = vadd.f32 %v2228_v33, %v1099_v37  ;;  %v2470_v42 = vpop.f32.mrb[15].mxu0  ;;  %v2240_v37 = vld [vmem:[%s3319_s3 + $0x1] ss:$0 sm:$0xff] }
 0x97e   :  { %v3078_v44 = vadd.f32 %v2774_v43, %v1100_v41  ;;  %v1157_v45 = vmul.f32 %v3073_v40, %v3073_v40 }
 0x980   :  { %v1159_v46 = vsel %vm77_vm0, %v1157_v45, 0.0  ;;  %v1158_v47 = vmul.f32 %v3078_v44, %v3078_v44  ;;  %v2671_v45 = vld [vmem:[%s3318_s4 + $0x48] sm:$0xff]  }
 0x981   :  { %1160 = vadd.xlane.f32.xlu1 %v1159_v46  ;;  %v2672_v46 = vld [vmem:[%s3318_s4 + $0x50] sm:$0xff]  }
 0x982   :  { %v1162_v48 = vsel %vm77_vm0, %v1158_v47, 0.0  ;;  %v2673_v47 = vld [vmem:[%s3318_s4 + $0x58] sm:$0xff]  }
 0x983   :  { %1163 = vadd.xlane.f32.xlu0 %v1162_v48  ;;  %v2674_v48 = vld [vmem:[%s3318_s4 + $0x60] sm:$0xff]  }
 0xa0e   :  { %v1161_v54 = vpop.xlane.xlu1 %1160 }
 0xa0f   :  { %v1165_v38 = vmul.f32 0.03125, %v1161_v54 }
 0xa10   :  { %v1164_v55 = vpop.xlane.xlu0 %1163 }
 0xa11   :  { %v1167_v56 = vadd.f32 1e-06, %v1165_v38  ;;  %v1166_v57 = vmul.f32 0.03125, %v1164_v55  ;;  %v2241_v55 = vld [vmem:[%s3319_s3 + $0x2] ss:$0 sm:$0xff] }
 0xa13   :  { %2729 = vrsqrt.f32 %v1167_v56  ;;  %v1168_v58 = vadd.f32 1e-06, %v1166_v57 }
 0xa15   :  { %2731 = vrsqrt.f32 %v1168_v58 }
 0xa1d   :  { %v2730_v59 = vpop.eup %2729 }
 0xa1e   :  { %v1171_v60 = vmul.f32 %v2730_v59, %v3073_v40 }
 0xa1f   :  { %v2732_v61 = vpop.eup %2731 }
 0xa20   :  { %v1172_v0 = vmul.f32 %v2732_v61, %v3078_v44  ;;  %v1177_v1 = vmul.f32 %v2232_v63, %v1171_v60 }
 0xa22   :  { %v1178_v3 = vmul.f32 %v2232_v63, %v1172_v0 }
 0xa24   :  { %v1179_v4 = vpack.c.bf16 %v1178_v3, %v1177_v1 }
 0xa26   :  { %2482 = vmatmul.mubr.msk.bf16.vlgmr.msra.gmra.mrb[16].mxu0 %vm77_vm0, %v1179_v4 }
 0xa27   :  { %2505 = vmatprep.mubr.msk.bf16.mxu0 %vm2776_vm1, %v2775_v2  ;;  %2498 = vmatpush3.bf16.msra.mxu0 %v2671_v45 }
 0xa28   :  { %2499 = vmatprep.subr.bf16.mxu0 %v2775_v2 }
 0xa2b   :  { %2500 = vmatpush3.bf16.msra.mxu0 %v2672_v46 }
 0xa2c   :  { %2501 = vmatprep.subr.bf16.mxu0 %v2775_v2 }
 0xa2f   :  { %2502 = vmatpush3.bf16.msra.mxu0 %v2673_v47 }
 0xa30   :  { %2503 = vmatprep.subr.bf16.mxu0 %v2775_v2 }
 0xa33   :  { %2504 = vmatpush3.bf16.msra.mxu0 %v2674_v48 }
 0xaf9   :  { %v1261_v8 = vpop.f32.mrb[16].mxu0 }
 0xafa   :  { %v3117_v9 = vadd.f32 %v2233_v7, %v1261_v8  ;;  %v2483_v10 = vpop.f32.mrb[17].mxu0 }
 0xafb   :  { %v1264_v11 = vpop.f32.mrb[18].mxu0 }
 0xafc   :  { %v3119_v12 = vadd.f32 %v2233_v7, %v1264_v11  ;;  %v2484_v13 = vpop.f32.mrb[19].mxu0  ;;  %v1268_v14 = vmul.f32 %v3117_v9, %v3117_v9  ;;  %v1514_v56 = vpack.c.bf16 %v3117_v9, %v3117_v9 }
 0xafe   :  { %v1270_v15 = vsel %vm77_vm0, %v1268_v14, 0.0  ;;  %v1269_v16 = vmul.f32 %v3119_v12, %v3119_v12  ;;  %v1515_v5 = vpack.c.bf16 %v3119_v12, %v3119_v12 }
 0xaff   :  { %1271 = vadd.xlane.f32.xlu0 %v1270_v15 }
 0xb00   :  { %v1273_v17 = vsel %vm77_vm0, %v1269_v16, 0.0 }
 0xb01   :  { %1274 = vadd.xlane.f32.xlu1 %v1273_v17 }
 0xb12   :  { %1294 = vrot.lane.b32.xlu1 %v1269_v16, %s2777_s13 }
 0xb15   :  { %1292 = vrot.lane.b32.xlu0 %v1268_v14, %s2777_s13 }
 0xb8c   :  { %v1272_v24 = vpop.xlane.xlu0 %1271 }
 0xb8d   :  { %v1276_v25 = vmul.f32 0.03125, %v1272_v24 }
 0xb8e   :  { %v1275_v26 = vpop.xlane.xlu1 %1274 }
 0xb8f   :  { %v1278_v27 = vadd.f32 1e-06, %v1276_v25  ;;  %v1277_v28 = vmul.f32 0.03125, %v1275_v26 }
 0xb90   :  { %v1293_v29 = vpop.permute.xlu0 %1292 }
 0xb91   :  { %2733 = vrsqrt.f32 %v1278_v27  ;;  %v1279_v30 = vadd.f32 1e-06, %v1277_v28  ;;  %v1298_v31 = vsel %vm77_vm0, %v1293_v29, 0.0 }
 0xb92   :  { %1299 = vadd.xlane.f32.xlu1 %v1298_v31  ;;  %v1295_v32 = vpop.permute.xlu1 %1294 }
 0xb93   :  { %2735 = vrsqrt.f32 %v1279_v30  ;;  %v1301_v33 = vsel %vm77_vm0, %v1295_v32, 0.0 }
 0xb94   :  { %1302 = vadd.xlane.f32.xlu0 %v1301_v33 }
 0xb9b   :  { %v2734_v34 = vpop.eup %2733 }
 0xb9c   :  { %v1282_v36 = vmul.f32 %v2734_v34, %v3117_v9 }
 0xb9d   :  { %v2736_v35 = vpop.eup %2735 }
 0xb9e   :  { %v1283_v39 = vmul.f32 %v2736_v35, %v3119_v12  ;;  %v1288_v41 = vmul.f32 %v2240_v37, %v1282_v36 }
 0xba0   :  { %v1289_v42 = vmul.f32 %v2240_v37, %v1283_v39 }
 0xba2   :  { %v1322_v43 = vpack.c.bf16 %v1289_v42, %v1288_v41 }
 0xba4   :  { %2494 = vmatmul.mubr.msk.bf16.vlgmr.msra.gmra.mrb[24].mxu1 %vm77_vm0, %v1322_v43 }
 0xc1f   :  { %v1300_v57 = vpop.xlane.xlu1 %1299 }
 0xc20   :  { %v1304_v58 = vmul.f32 0.03125, %v1300_v57 }
 0xc21   :  { %v1303_v60 = vpop.xlane.xlu0 %1302 }
 0xc22   :  { %v1306_v59 = vadd.f32 1e-06, %v1304_v58 }
 0xc24   :  { %2737 = vrsqrt.f32 %v1306_v59 }
 0xc2e   :  { %v2738_v1 = vpop.eup %2737 }
 0xc2f   :  { %v1310_v7 = vmul.f32 %v2738_v1, %v3117_v9  ;;  %v1305_v9 = vmul.f32 0.03125, %v1303_v60 }
 0xc31   :  { %v1307_v19 = vadd.f32 1e-06, %v1305_v9 }
 0xc33   :  { %2739 = vrsqrt.f32 %v1307_v19 }
 0xc3d   :  { %v2740_v20 = vpop.eup %2739 }
 0xc3e   :  { %v1311_v21 = vmul.f32 %v2740_v20, %v3119_v12 }
 0xc77   :  { %v1396_v49 = vpop.f32.mrb[24].mxu1 }
 0xc78   :  { %v1397_v50 = vadd.f32 %v2242_v62, %v1396_v49  ;;  %v2495_v51 = vpop.f32.mrb[25].mxu1 }
 0xc79   :  { %v1399_v52 = vpop.f32.mrb[26].mxu1 }
 0xc7a   :  { %v1400_v53 = vadd.f32 %v2242_v62, %v1399_v52  ;;  %1500 = vrot.lane.b32.xlu1 %v1397_v50, %s2777_s13  ;;  %1494 = vrot.lane.b32.xlu0 %v1397_v50, %s2779_s10  ;;  %v2496_v54 = vpop.f32.mrb[27].mxu1 }
 0xc7c   :  { %v1403_v38 = vpack.c.bf16 %v1400_v53, %v1397_v50 }
 0xc7e   :  { %1506 = vrot.lane.b32.xlu1 %v1397_v50, %s2780_s11  ;;  %1496 = vrot.lane.b32.xlu0 %v1400_v53, %s2779_s10 }
 0xc7f   :  { %2506 = vmatmul.mubr.msk.bf16.vlgmr.msra.gmra.mrb[20].mxu0 %vm348_vm2, %v1403_v38 }
 0xc82   :  { %1317 = vrot.lane.b32.xlu1 %v2241_v55, %s2778_s16  ;;  %1508 = vrot.lane.b32.xlu0 %v1400_v53, %s2780_s11 }
 0xc86   :  { %1502 = vrot.lane.b32.xlu1 %v1400_v53, %s2777_s13 }
 0xc8a   :  { %1531 = vrot.lane.b32.xlu1 %v1514_v56, %s2781_s12 }
 0xcec   :  { %v1501_v61 = vpop.permute.xlu1 %1500  ;;  %v1495_v63 = vpop.permute.xlu0 %1494 }
 0xced   :  { %v1520_v0 = vpack.c.bf16 %v1495_v63, %v1397_v50 }
 0xcef   :  { %1526 = vrot.lane.b32.xlu0 %v1520_v0, %s2782_s14 }
 0xcf0   :  { %v1507_v3 = vpop.permute.xlu1 %1506  ;;  %v1497_v6 = vpop.permute.xlu0 %1496 }
 0xcf1   :  { %v1521_v4 = vpack.c.bf16 %v1507_v3, %v1501_v61  ;;  %v1522_v10 = vpack.c.bf16 %v1497_v6, %v1400_v53 }
 0xcf3   :  { %1528 = vrot.lane.b32.xlu1 %v1521_v4, %s2782_s14  ;;  %1598 = vrot.lane.b32.xlu0 %v1515_v5, %s2781_s12 }
 0xcf4   :  { %v1318_v8 = vpop.permute.xlu1 %1317  ;;  %v1509_v13 = vpop.permute.xlu0 %1508 }
 0xcf5   :  { %v1320_v11 = vmul.f32 %v1318_v8, %v1310_v7  ;;  %v1321_v22 = vmul.f32 %v1318_v8, %v1311_v21 }
 0xcf7   :  { %1593 = vrot.lane.b32.xlu1 %v1522_v10, %s2782_s14  ;;  %v1512_v15 = vpack.c.bf16 %v1320_v11, %v1320_v11  ;;  %v1513_v26 = vpack.c.bf16 %v1321_v22, %v1321_v22 }
 0xcf8   :  { %v1503_v14 = vpop.permute.xlu1 %1502 }
 0xcf9   :  { %v1523_v16 = vpack.c.bf16 %v1509_v13, %v1503_v14 }
 0xcfb   :  { %1659 = vrot.lane.b32.xlu1 %v1512_v15, %s2777_s13  ;;  %1595 = vrot.lane.b32.xlu0 %v1523_v16, %s2782_s14 }
 0xcfc   :  { %v1532_v17 = vpop.permute.xlu1 %1531 }
 0xcfd   :  { %v1540_v18 = vsel %vm454_vm3, %v1532_v17, 0  ;;  %2595 = vmatprep.subr.msk.bf16.mxu1 %vm454_vm3, %v1532_v17 }
 0xcfe   :  { %2510 = vmatpush3.bf16.xpose.msra.mxu1 %v1540_v18 }
 0xd52   :  { %v1465_v23 = vpop.f32.mrb[20].mxu0 }
 0xd53   :  { %1480 = vrot.lane.b32.xlu1 %v1465_v23, %s2781_s12  ;;  %1474 = vrot.lane.b32.xlu0 %v1465_v23, %s2777_s13  ;;  %v2507_v24 = vpop.f32.mrb[21].mxu0 }
 0xd54   :  { %v1468_v25 = vpop.f32.mrb[22].mxu0 }
 0xd55   :  { %v2508_v27 = vpop.f32.mrb[23].mxu0 }
 0xd57   :  { %1720 = vrot.lane.b32.xlu1 %v1513_v26, %s2777_s13  ;;  %1486 = vrot.lane.b32.xlu0 %v1465_v23, %s2778_s16 }
 0xd5b   :  { %1482 = vrot.lane.b32.xlu1 %v1468_v25, %s2781_s12  ;;  %1476 = vrot.lane.b32.xlu0 %v1468_v25, %s2777_s13 }
 0xd5f   :  { %1488 = vrot.lane.b32.xlu0 %v1468_v25, %s2778_s16 }
 0xd61   :  { %v1527_v12 = vpop.permute.xlu0 %1526 }
 0xd62   :  { %2511 = vmatprep.mubr.msk.bf16.mxu1 %vm454_vm3, %v1527_v12 }
 0xd65   :  { %v1529_v28 = vpop.permute.xlu1 %1528  ;;  %v1599_v29 = vpop.permute.xlu0 %1598 }
 0xd66   :  { %v1607_v30 = vsel %vm454_vm3, %v1599_v29, 0  ;;  %2512 = vmatmul.mubr.msk.bf16.vlgmr.msra.gmra.mrb[28].mxu1 %vm454_vm3, %v1529_v28  ;;  %2596 = vmatprep.subr.msk.bf16.mxu1 %vm454_vm3, %v1599_v29 }
 0xd67   :  { %2516 = vmatpush3.bf16.xpose.msra.mxu1 %v1607_v30 }
 0xd69   :  { %v1594_v31 = vpop.permute.xlu1 %1593 }
 0xd6a   :  { %2517 = vmatprep.mubr.msk.bf16.mxu1 %vm454_vm3, %v1594_v31 }
 0xd6d   :  { %v1660_v32 = vpop.permute.xlu1 %1659  ;;  %v1596_v33 = vpop.permute.xlu0 %1595 }
 0xd6e   :  { %2518 = vmatmul.mubr.msk.bf16.vlgmr.msra.gmra.mrb[32].mxu1 %vm454_vm3, %v1596_v33  ;;  %2597 = vmatprep.subr.msk.bf16.mxu1 %vm77_vm0, %v1660_v32  ;;  %v1668_v34 = vsel %vm77_vm0, %v1660_v32, 0  ;;  %v1886_v36 = vsel %vm808_vm4, %v1660_v32, 0 }
 0xd6f   :  { %2599 = vmatprep.subr.msk.bf16.mxu0 %vm808_vm4, %v1660_v32  ;;  %2522 = vmatpush3.bf16.xpose.msra.mxu1 %v1668_v34 }
 0xd70   :  { %2534 = vmatpush3.bf16.msra.mxu0 %v1886_v36 }
 0xdc5   :  { %v1481_v35 = vpop.permute.xlu1 %1480  ;;  %v1475_v37 = vpop.permute.xlu0 %1474 }
 0xdc6   :  { %v1516_v39 = vpack.c.bf16 %v1475_v37, %v1465_v23 }
 0xdc8   :  { %2523 = vmatprep.mubr.msk.bf16.mxu1 %vm77_vm0, %v1516_v39 }
 0xdc9   :  { %v3213_v41 = vpop.permute.xlu1 %1720  ;;  %v1487_v42 = vpop.permute.xlu0 %1486 }
 0xdca   :  { %v1517_v43 = vpack.c.bf16 %v1487_v42, %v1481_v35  ;;  %2598 = vmatprep.subr.msk.bf16.mxu1 %vm77_vm0, %v3213_v41  ;;  %2600 = vmatprep.subr.msk.bf16.mxu0 %vm808_vm4, %v3213_v41  ;;  %v1729_v45 = vsel %vm77_vm0, %v3213_v41, 0 }
 0xdcc   :  { %2524 = vmatmul.mubr.msk.bf16.vlgmr.msra.gmra.mrb[28].mxu1 %vm77_vm0, %v1517_v43 }
 0xdcd   :  { %2528 = vmatpush3.bf16.xpose.msra.mxu1 %v1729_v45  ;;  %v1477_v46 = vpop.permute.xlu0 %1476  ;;  %v1483_v48 = vpop.permute.xlu1 %1482 }
 0xdce   :  { %v1518_v47 = vpack.c.bf16 %v1477_v46, %v1468_v25  ;;  %2565 = vmatprep.subr.bf16.mxu1 %v2775_v2 }
 0xdd0   :  { %2529 = vmatprep.mubr.msk.bf16.mxu1 %vm77_vm0, %v1518_v47 }
 0xdd1   :  { %v1489_v62 = vpop.permute.xlu0 %1488 }
 0xdd2   :  { %v1519_v49 = vpack.c.bf16 %v1489_v62, %v1483_v48 }
 0xdd4   :  { %2530 = vmatmul.mubr.msk.bf16.vlgmr.msra.gmra.mrb[32].mxu1 %vm77_vm0, %v1519_v49 }
 0xdd5   :  { %2569 = vmatprep.mubr.msk.bf16.mxu1 %vm2776_vm1, %v2775_v2 }
 0xe9f   :  { %v2525_v50 = vpop.f32.mrb[28].mxu1 }
 0xea0   :  { %v1782_v51 = vmul.f32 0.25, %v2525_v50  ;;  %v1704_v52 = vpop.f32.mrb[29].mxu1 }
 0xea1   :  { %v1780_v53 = vmul.f32 0.25, %v1704_v52  ;;  %v2526_v54 = vpop.f32.mrb[30].mxu1 }
 0xea2   :  { %v1707_v38 = vpop.f32.mrb[31].mxu1  ;;  %v1794_v55 = vsel %vm454_vm3, %v1782_v51, -inf  ;;  %v1783_v59 = vmul.f32 0.25, %v2526_v54 }
 0xea3   :  { %v1781_v56 = vmul.f32 0.25, %v1707_v38  ;;  %1795 = vmax.xlane.f32.xlu0 %v1794_v55  ;;  %v1788_v57 = vsel %vm454_vm3, %v1780_v53, -inf }
 0xea4   :  { %1789 = vmax.xlane.f32.xlu1 %v1788_v57  ;;  %v1797_v3 = vsel %vm454_vm3, %v1783_v59, -inf }
 0xea5   :  { %v1791_v58 = vsel %vm454_vm3, %v1781_v56, -inf }
 0xea7   :  { %1792 = vmax.xlane.f32.xlu0 %v1791_v58  ;;  %v2531_v60 = vpop.f32.mrb[32].mxu1 }
 0xea8   :  { %v1765_v61 = vpop.f32.mrb[33].mxu1  ;;  %v1786_v4 = vmul.f32 0.25, %v2531_v60 }
 0xea9   :  { %v1784_v63 = vmul.f32 0.25, %v1765_v61  ;;  %v2532_v0 = vpop.f32.mrb[34].mxu1 }
 0xeaa   :  { %v1768_v1 = vpop.f32.mrb[35].mxu1  ;;  %v1787_v8 = vmul.f32 0.25, %v2532_v0  ;;  %v1806_v10 = vsel %vm454_vm3, %v1786_v4, -inf }
 0xeab   :  { %v1785_v5 = vmul.f32 0.25, %v1768_v1  ;;  %1798 = vmax.xlane.f32.xlu0 %v1797_v3  ;;  %v1800_v6 = vsel %vm454_vm3, %v1784_v63, -inf }
 0xeac   :  { %1801 = vmax.xlane.f32.xlu1 %v1800_v6  ;;  %v1809_v11 = vsel %vm454_vm3, %v1787_v8, -inf }
 0xead   :  { %v1803_v7 = vsel %vm454_vm3, %v1785_v5, -inf }
 0xeaf   :  { %1804 = vmax.xlane.f32.xlu0 %v1803_v7 }
 0xeb0   :  { %1807 = vmax.xlane.f32.xlu1 %v1806_v10 }
 0xeb3   :  { %1810 = vmax.xlane.f32.xlu0 %v1809_v11 }
 0xf30   :  { %v1796_v13 = vpop.xlane.xlu0 %1795 }
 0xf31   :  { %v1814_v14 = vsub.f32 %v1782_v51, %v1796_v13  ;;  %v1790_v15 = vpop.xlane.xlu1 %1789  ;;  %v1943_v13 = vsel %vm808_vm4, %v3213_v41, 0  ;;  %v2675_v41 = vld [vmem:[%s3318_s4 + $0x68] sm:$0xff]  }
 0xf32   :  { %v1812_v16 = vsub.f32 %v1780_v53, %v1790_v15 }
 0xf33   :  { %v1824_v17 = vmul.f32 1.442695, %v1814_v14 }
 0xf34   :  { %v1820_v18 = vmul.f32 1.442695, %v1812_v16  ;;  %v1793_v9 = vpop.xlane.xlu0 %1792 }
 0xf35   :  { %v1813_v19 = vsub.f32 %v1781_v56, %v1793_v9 }
 0xf36   :  { %2741 = vpow2.f32 %v1820_v18 }
 0xf37   :  { %v1822_v20 = vmul.f32 1.442695, %v1813_v19  ;;  %2743 = vpow2.f32 %v1824_v17 }
 0xf38   :  { %v1799_v21 = vpop.xlane.xlu0 %1798 }
 0xf39   :  { %2745 = vpow2.f32 %v1822_v20  ;;  %v1815_v22 = vsub.f32 %v1783_v59, %v1799_v21  ;;  %v1802_v23 = vpop.xlane.xlu1 %1801  ;;  %v2676_v21 = vld [vmem:[%s3318_s4 + $0x70] sm:$0xff]  }
 0xf3a   :  { %v1816_v24 = vsub.f32 %v1784_v63, %v1802_v23  ;;  %v2678_v23 = vld [vmem:[%s3318_s4 + $0x80] sm:$0xff]  }
 0xf3b   :  { %v1826_v25 = vmul.f32 1.442695, %v1815_v22  ;;  %v2677_v22 = vld [vmem:[%s3318_s4 + $0x78] sm:$0xff]  }
 0xf3c   :  { %v1828_v26 = vmul.f32 1.442695, %v1816_v24  ;;  %v1805_v27 = vpop.xlane.xlu0 %1804  ;;  %v2679_v24 = vld [vmem:[%s3318_s4 + $0x88] sm:$0xff]  }
 0xf3d   :  { %2747 = vpow2.f32 %v1826_v25  ;;  %v1817_v12 = vsub.f32 %v1785_v5, %v1805_v27  ;;  %v1808_v28 = vpop.xlane.xlu1 %1807  ;;  %v2680_v25 = vld [vmem:[%s3318_s4 + $0x90] sm:$0xff]  }
 0xf3e   :  { %2749 = vpow2.f32 %v1828_v26  ;;  %v1818_v29 = vsub.f32 %v1786_v4, %v1808_v28  ;;  %v2681_v28 = vld [vmem:[%s3318_s4 + $0x98] sm:$0xff]  }
 0xf3f   :  { %v1830_v30 = vmul.f32 1.442695, %v1817_v12 }
 0xf40   :  { %v2742_v31 = vpop.eup %2741  ;;  %v1832_v32 = vmul.f32 1.442695, %v1818_v29  ;;  %v1811_v33 = vpop.xlane.xlu0 %1810 }
 0xf41   :  { %2751 = vpow2.f32 %v1830_v30  ;;  %v1819_v34 = vsub.f32 %v1787_v8, %v1811_v33  ;;  %v1836_v36 = vsel %vm454_vm3, %v2742_v31, 0.0  ;;  %v2744_v35 = vpop.eup %2743  ;;  %v2682_v30 = vld [vmem:[%s3318_s4 + $0xa0] sm:$0xff]  }
 0xf42   :  { %2753 = vpow2.f32 %v1832_v32  ;;  %1837 = vadd.xlane.f32.xlu1 %v1836_v36  ;;  %v1842_v43 = vsel %vm454_vm3, %v2744_v35, 0.0  ;;  %v2683_v36 = vld [vmem:[%s3318_s4 + $0xa8] sm:$0xff]  }
 0xf43   :  { %v2746_v37 = vpop.eup %2745  ;;  %v1834_v39 = vmul.f32 1.442695, %v1819_v34 }
 0xf44   :  { %v1839_v42 = vsel %vm454_vm3, %v2746_v37, 0.0 }
 0xf45   :  { %2755 = vpow2.f32 %v1834_v39  ;;  %1840 = vadd.xlane.f32.xlu0 %v1839_v42  ;;  %v2133_v42 = vsel %vm348_vm2, %v2683_v36, 0 }
 0xf46   :  { %1843 = vadd.xlane.f32.xlu1 %v1842_v43  ;;  %2566 = vmatpush3.bf16.xpose.msra.mxu1 %v2133_v42  ;;  %v2684_v43 = vld [vmem:[%s3318_s4 + $0xb0] sm:$0xff]  }
 0xf47   :  { %v2748_v45 = vpop.eup %2747  ;;  %2567 = vmatprep.subr.bf16.mxu1 %v2775_v2 }
 0xf48   :  { %v2750_v46 = vpop.eup %2749  ;;  %v1845_v47 = vsel %vm454_vm3, %v2748_v45, 0.0 }
 0xf49   :  { %1846 = vadd.xlane.f32.xlu0 %v1845_v47  ;;  %v1848_v48 = vsel %vm454_vm3, %v2750_v46, 0.0 }
 0xf4a   :  { %1849 = vadd.xlane.f32.xlu1 %v1848_v48 }
 0xf4b   :  { %v2752_v62 = vpop.eup %2751 }
 0xf4c   :  { %v2754_v49 = vpop.eup %2753  ;;  %v1851_v50 = vsel %vm454_vm3, %v2752_v62, 0.0 }
 0xf4d   :  { %1852 = vadd.xlane.f32.xlu0 %v1851_v50  ;;  %v1854_v51 = vsel %vm454_vm3, %v2754_v49, 0.0 }
 0xf4e   :  { %1855 = vadd.xlane.f32.xlu1 %v1854_v51 }
 0xf4f   :  { %v2756_v52 = vpop.eup %2755 }
 0xf50   :  { %v1857_v53 = vsel %vm454_vm3, %v2756_v52, 0.0 }
 0xf51   :  { %1858 = vadd.xlane.f32.xlu0 %v1857_v53 }
 0xfcf   :  { %v1838_v54 = vpop.xlane.xlu1 %1837 }
 0xfd0   :  { %2757 = vrcp.f32 %v1838_v54 }
 0xfd2   :  { %v1841_v38 = vpop.xlane.xlu0 %1840 }
 0xfd3   :  { %2759 = vrcp.f32 %v1841_v38  ;;  %v1844_v55 = vpop.xlane.xlu1 %1843 }
 0xfd4   :  { %2761 = vrcp.f32 %v1844_v55 }
 0xfd6   :  { %v1847_v56 = vpop.xlane.xlu0 %1846 }
 0xfd7   :  { %2763 = vrcp.f32 %v1847_v56  ;;  %v1850_v57 = vpop.xlane.xlu1 %1849 }
 0xfd8   :  { %2765 = vrcp.f32 %v1850_v57 }
 0xfda   :  { %v1853_v58 = vpop.xlane.xlu0 %1852  ;;  %v2758_v59 = vpop.eup %2757 }
 0xfdb   :  { %2767 = vrcp.f32 %v1853_v58  ;;  %v1856_v60 = vpop.xlane.xlu1 %1855  ;;  %v1868_v0 = vmul.f32 %v2758_v59, %v2742_v31 }
 0xfdc   :  { %2769 = vrcp.f32 %v1856_v60 }
 0xfdd   :  { %v2760_v61 = vpop.eup %2759 }
 0xfde   :  { %v1859_v63 = vpop.xlane.xlu0 %1858  ;;  %v1869_v1 = vmul.f32 %v2760_v61, %v2746_v37  ;;  %v2762_v3 = vpop.eup %2761 }
 0xfdf   :  { %2771 = vrcp.f32 %v1859_v63  ;;  %v1870_v6 = vmul.f32 %v2762_v3, %v2744_v35 }
 0xfe0   :  { %v1876_v4 = vpack.c.bf16 %v1869_v1, %v1868_v0  ;;  %v2273_v1 = vld [vmem:[%s3319_s3 + $0x5] ss:$0 sm:$0xff] }
 0xfe1   :  { %v2764_v5 = vpop.eup %2763 }
 0xfe2   :  { %v1871_v7 = vmul.f32 %v2764_v5, %v2748_v45  ;;  %2535 = vmatprep.mubr.msk.bf16.mxu0 %vm454_vm3, %v1876_v4  ;;  %v2766_v8 = vpop.eup %2765  ;;  %v2136_v45 = vsel %vm348_vm2, %v2684_v43, 0 }
 0xfe3   :  { %v1872_v14 = vmul.f32 %v2766_v8, %v2750_v46  ;;  %2568 = vmatpush3.bf16.xpose.msra.mxu1 %v2136_v45 }
 0xfe4   :  { %v1877_v10 = vpack.c.bf16 %v1871_v7, %v1870_v6 }
 0xfe5   :  { %v2768_v11 = vpop.eup %2767 }
 0xfe6   :  { %2536 = vmatmul.mubr.msk.bf16.vlgmr.msra.gmra.mrb[24].mxu0 %vm454_vm3, %v1877_v10  ;;  %v1873_v15 = vmul.f32 %v2768_v11, %v2752_v62  ;;  %v2770_v16 = vpop.eup %2769 }
 0xfe7   :  { %2540 = vmatpush3.bf16.msra.mxu0 %v1943_v13  ;;  %v1874_v9 = vmul.f32 %v2770_v16, %v2754_v49 }
 0xfe8   :  { %v1878_v17 = vpack.c.bf16 %v1873_v15, %v1872_v14  ;;  %2545 = vmatprep.subr.bf16.mxu0 %v2775_v2 }
 0xfe9   :  { %v2772_v18 = vpop.eup %2771 }
 0xfea   :  { %v1875_v19 = vmul.f32 %v2772_v18, %v2756_v52  ;;  %2541 = vmatprep.mubr.msk.bf16.mxu0 %vm454_vm3, %v1878_v17 }
 0xfec   :  { %v1879_v20 = vpack.c.bf16 %v1875_v19, %v1874_v9 }
 0xfee   :  { %2542 = vmatmul.mubr.msk.bf16.vlgmr.msra.gmra.mrb[28].mxu0 %vm454_vm3, %v1879_v20 }
 0xfef   :  { %2561 = vmatprep.mubr.msk.bf16.mxu0 %vm2776_vm1, %v2775_v2  ;;  %2546 = vmatpush3.bf16.msra.mxu0 %v2675_v41 }
 0xff0   :  { %2547 = vmatprep.subr.bf16.mxu0 %v2775_v2 }
 0xff3   :  { %2548 = vmatpush3.bf16.msra.mxu0 %v2676_v21 }
 0xff4   :  { %2549 = vmatprep.subr.bf16.mxu0 %v2775_v2 }
 0xff7   :  { %2550 = vmatpush3.bf16.msra.mxu0 %v2677_v22 }
 0xff8   :  { %2551 = vmatprep.subr.bf16.mxu0 %v2775_v2 }
 0xffb   :  { %2552 = vmatpush3.bf16.msra.mxu0 %v2678_v23 }
 0xffc   :  { %2553 = vmatprep.subr.bf16.mxu0 %v2775_v2 }
 0xfff   :  { %2554 = vmatpush3.bf16.msra.mxu0 %v2679_v24 }
0x1000   :  { %2555 = vmatprep.subr.bf16.mxu0 %v2775_v2 }
0x1003   :  { %2556 = vmatpush3.bf16.msra.mxu0 %v2680_v25 }
0x1004   :  { %2557 = vmatprep.subr.bf16.mxu0 %v2775_v2 }
0x1007   :  { %2558 = vmatpush3.bf16.msra.mxu0 %v2681_v28 }
0x1008   :  { %2559 = vmatprep.subr.bf16.mxu0 %v2775_v2 }
0x100b   :  { %2560 = vmatpush3.bf16.msra.mxu0 %v2682_v30 }
0x10b9   :  { %v2537_v26 = vpop.f32.mrb[24].mxu0 }
0x10ba   :  { %v1922_v27 = vpop.f32.mrb[25].mxu0 }
0x10bb   :  { %v2538_v12 = vpop.f32.mrb[26].mxu0 }
0x10bc   :  { %v1925_v29 = vpop.f32.mrb[27].mxu0 }
0x10c1   :  { %v2543_v31 = vpop.f32.mrb[28].mxu0 }
0x10c2   :  { %v2629_v32 = vpack.i.bf16 %v2543_v31, %v2537_v26  ;;  %v1979_v33 = vpop.f32.mrb[29].mxu0 }
0x10c3   :  { %v2544_v34 = vpop.f32.mrb[30].mxu0 }
0x10c4   :  { %v2634_v35 = vpack.i.bf16 %v2544_v34, %v2538_v12  ;;  %2630 = vrot.lane.b32.xlu0 %v2629_v32, %s2781_s12  ;;  %v1982_v37 = vpop.f32.mrb[31].mxu0 }
0x10c5   :  { %v2624_v39 = vpack.i.bf16 %v1982_v37, %v1925_v29 }
0x10c7   :  { %2625 = vrot.lane.b32.xlu1 %v2624_v39, %s2778_s16 }
0x10cb   :  { %2635 = vrot.lane.b32.xlu1 %v2634_v35, %s2777_s13 }
0x1136   :  { %v2631_v47 = vpop.permute.xlu0 %2630 }
0x1137   :  { %v2633_v51 = vunpack.i.h.bf16 %v2631_v47  ;;  %v2632_v52 = vunpack.i.l.bf16 %v2631_v47 }
0x1139   :  { %v2626_v46 = vpop.permute.xlu1 %2625 }
0x113a   :  { %v2628_v48 = vunpack.i.h.bf16 %v2626_v46  ;;  %v2627_v62 = vunpack.i.l.bf16 %v2626_v46 }
0x113c   :  { %v2019_v49 = vsel %vm77_vm0, %v1979_v33, %v2628_v48  ;;  %v2018_v50 = vsel %vm77_vm0, %v1922_v27, %v2627_v62 }
0x113d   :  { %v2636_v2 = vpop.permute.xlu1 %2635  ;;  %v2020_v38 = vsel %vm348_vm2, %v2018_v50, %v2632_v52  ;;  %v2021_v55 = vsel %vm348_vm2, %v2019_v49, %v2633_v51 }
0x113e   :  { %v2638_v53 = vunpack.i.h.bf16 %v2636_v2  ;;  %v2637_v54 = vunpack.i.l.bf16 %v2636_v2 }
0x1140   :  { %v2022_v56 = vsel %vm945_vm5, %v2020_v38, %v2637_v54  ;;  %v2023_v57 = vsel %vm945_vm5, %v2021_v55, %v2638_v53 }
0x1141   :  { %v2024_v58 = vpack.c.bf16 %v2023_v57, %v2022_v56 }
0x1143   :  { %2562 = vmatmul.mubr.bf16.vlgmr.msra.gmra.mrb[32].mxu0 %v2024_v58 }
0x1216   :  { %v2107_v59 = vpop.f32.mrb[32].mxu0 }
0x1217   :  { %v2563_v60 = vpop.f32.mrb[33].mxu0 }
0x1218   :  { %v2110_v61 = vpop.f32.mrb[34].mxu0 }
0x1219   :  { %v2114_v63 = vpack.c.bf16 %v2110_v61, %v2107_v59  ;;  %v2564_v0 = vpop.f32.mrb[35].mxu0 }
0x121b   :  { %2570 = vmatmul.mubr.msk.bf16.vlgmr.msra.gmra.mrb[36].mxu1 %vm348_vm2, %v2114_v63 }
0x12ee   :  { %v2172_v3 = vpop.f32.mrb[36].mxu1 }
0x12ef   :  { %v2173_v4 = vadd.f32 %v2273_v1, %v2172_v3  ;;  %v2571_v5 = vpop.f32.mrb[37].mxu1 }
0x12f0   :  { %v2175_v6 = vpop.f32.mrb[38].mxu1 }
0x12f1   :  { %v2179_v7 = vadd.f32 %v2173_v4, %v3073_v40  ;;  %v2176_v8 = vadd.f32 %v2273_v1, %v2175_v6  ;;  %v2572_v10 = vpop.f32.mrb[39].mxu1 }
0x12f3   :  { %2181 = vst.msk [vmem:[%s3320_s5] sm:$0xff] %vm77_vm0, %v2179_v7  ;;  %v2180_v11 = vadd.f32 %v2176_v8, %v3078_v44 }
0x12f5   :  { %2182 = vst.msk [vmem:[%s3320_s5 + $0x8] sm:$0xff] %vm77_vm0, %v2180_v11 }

</bundles_post_ra>
